<compile_context>
chip_gen: v6e
topology: v6e:2x2x1
jax: 0.10.0
libtpu: 0.0.40
codegen_flags: <defaults>
</compile_context>

<pallas_src>
import functools

import jax
import jax.numpy as jnp
from jax.experimental import pallas as pl
from jax.experimental.pallas import tpu as pltpu


def _chip_budget():
    """Return (streamed-tile target bytes, scoped-VMEM cap bytes) for this chip."""
    vmem_bytes = 64 << 20                      # conservative default (v7x: 64 MiB / TC)
    try:
        info = pltpu.get_tpu_info()
        vmem_bytes = int(getattr(info, "vmem_capacity_bytes", vmem_bytes))
    except Exception:
        pass
    if vmem_bytes >= (100 << 20):              # v5e / v6e: 128 MiB VMEM
        return (16 << 20), (96 << 20)
    return (8 << 20), (48 << 20)               # v7x: leave headroom under 64 MiB


def _bilinear_attn_kernel(q_ref, wT_ref, b_ref, d_ref, mask_ref, out_ref,
                          wy_ref, m_ref, denom_ref, *, training, num_l, tl):
    """One grid step = (batch tile i, L tile l).

    q_ref     : [bt, Qh]       question hidden (per batch tile, resident over l)
    wT_ref    : [Qh, Dh]       transposed nn.Linear weight (resident)
    b_ref     : [1, Dh]        nn.Linear bias (resident)
    d_ref     : [bt, tl, Dh]   document hiddens (streamed tile, f32 or bf16)
    mask_ref  : [bt, tl]       int32, 1 = padding
    out_ref   : [bt, Lp]       output block, VMEM-resident across the l axis
    wy_ref    : [bt, 1, Dh]    scratch: Wy in the streamed dtype
    m_ref     : [bt, 1]        scratch: running max (f32)
    denom_ref : [bt, 1]        scratch: running sum(exp) (f32)
    """
    l = pl.program_id(1)
    neg_inf = jnp.float32(-jnp.inf)

    @pl.when(l == 0)
    def _init():
        # Wy = q @ W^T + b, once per batch tile, f32 on the MXU.
        wy = jnp.dot(q_ref[...].astype(jnp.float32), wT_ref[...].astype(jnp.float32),
                     preferred_element_type=jnp.float32)
        wy = wy + b_ref[...].astype(jnp.float32)                  # [bt, Dh]
        wy_ref[...] = wy[:, None, :].astype(wy_ref.dtype)         # [bt, 1, Dh]
        m_ref[...] = jnp.full_like(m_ref, -jnp.inf)
        denom_ref[...] = jnp.zeros_like(denom_ref)

    # xWy for this L tile: batched MXU contraction over Dh, f32 accumulate.
    #   [bt, 1, Dh] . [bt, tl, Dh] -> [bt, 1, tl]
    s3 = jnp.einsum("bqd,bkd->bqk", wy_ref[...], d_ref[...],
                    preferred_element_type=jnp.float32)
    s = s3.reshape(s3.shape[0], s3.shape[2])                      # [bt, tl]

    # masked_fill(d_mask == 1, -inf)
    s = jnp.where(mask_ref[...] != 0, neg_inf, s)

    # Stash raw masked scores into the resident output block (finalized below).
    if num_l == 1:
        out_ref[...] = s
    else:
        col = pl.multiple_of(l * tl, tl)
        out_ref[:, pl.ds(col, tl)] = s

    # Online running max / sum(exp) across L tiles (all f32, full-vreg [bt, tl] ops).
    m_prev = m_ref[...]
    m_new = jnp.maximum(m_prev, jnp.max(s, axis=1, keepdims=True))
    # Guard fully-masked-so-far rows: keep sums at 0 instead of poisoning with NaN.
    m_safe = jnp.where(m_new == neg_inf, jnp.float32(0.0), m_new)
    scale = jnp.where(m_prev == neg_inf, jnp.float32(0.0), jnp.exp(m_prev - m_safe))
    denom_ref[...] = denom_ref[...] * scale + jnp.sum(jnp.exp(s - m_safe),
                                                      axis=1, keepdims=True)
    m_ref[...] = m_new

    @pl.when(l == num_l - 1)
    def _finalize():
        scores = out_ref[...]                      # raw masked scores [bt, Lp], f32
        sh = scores - m_ref[...]                   # fully-masked rows -> NaN (matches PyTorch)
        if training:
            out_ref[...] = sh - jnp.log(denom_ref[...])           # log_softmax
        else:
            out_ref[...] = jnp.exp(sh) / denom_ref[...]           # softmax, exact divide


def bilinear_attention(d_hiddens, q_hidden, d_mask, weight, bias, *,
                       training=False, batch_block=None, l_block=None):
    """weight: [Dh, Qh] (PyTorch nn.Linear layout), bias: [Dh].

    d_hiddens may be f32 or bf16 (bf16 recommended: halves HBM traffic in this
    bandwidth-bound kernel; softmax math stays f32).  Output alpha is [B, L] f32.
    """
    B, L, Dh = d_hiddens.shape
    Qh = q_hidden.shape[-1]
    assert weight.shape == (Dh, Qh) and bias.shape == (Dh,)
    assert q_hidden.shape == (B, Qh) and d_mask.shape == (B, L)

    wT = jnp.transpose(weight).astype(jnp.float32)        # [Qh, Dh]
    b2 = bias.reshape(1, Dh).astype(jnp.float32)
    mask = d_mask.astype(jnp.int32)

    itemsize = jnp.dtype(d_hiddens.dtype).itemsize
    q_itemsize = jnp.dtype(q_hidden.dtype).itemsize
    target_bytes, vmem_cap = _chip_budget()

    # ---- choose the L tile (tl) --------------------------------------------
    row_bytes = L * Dh * itemsize                          # one batch row, full L
    if l_block is not None:
        tl = min(int(l_block), L)
        if tl < L:
            tl = max(128, (tl // 128) * 128)
    elif row_bytes > target_bytes:
        # A single full-L row blows the tile budget: tile L (online softmax).
        tl = max(128, (target_bytes // max(8 * Dh * itemsize, 1)) // 128 * 128)
        tl = min(tl, L)
    else:
        tl = L
    if tl >= L:
        tl, num_l, Lp = L, 1, L
    else:
        num_l = int(pl.cdiv(L, tl))
        Lp = num_l * tl

    # ---- choose the batch tile (bt) ----------------------------------------
    if batch_block is not None:
        bt = int(batch_block)
    elif num_l > 1:
        bt = 8
    else:
        bt = max(8, int(target_bytes // max(row_bytes, 1)) // 8 * 8)
    if bt >= B:
        bt = B                                   # single full-batch block (layout-legal)
    else:
        bt = max(8, (bt // 8) * 8)               # keep sublane (batch) dim 8-aligned
    num_b = int(pl.cdiv(B, bt))
    # Best-effort even split of the "parallel" batch axis across v7x's 2 TensorCores.
    while num_b > 1 and (num_b % 2 == 1) and bt > 8:
        bt -= 8
        num_b = int(pl.cdiv(B, bt))
    Bp = num_b * bt

    # ---- pad batch / sequence; padded positions are masked (1) -------------
    if Bp != B or Lp != L:
        d_hiddens = jnp.pad(d_hiddens, ((0, Bp - B), (0, Lp - L), (0, 0)))
        q_hidden = jnp.pad(q_hidden, ((0, Bp - B), (0, 0)))
        mask = jnp.pad(mask, ((0, Bp - B), (0, Lp - L)), constant_values=1)

    # ---- scoped VMEM budget: double-buffered blocks + residents + headroom --
    d_tile = bt * tl * Dh * itemsize
    io_tile = bt * Lp * 4 + bt * tl * 4 + bt * Qh * q_itemsize
    resident = Qh * Dh * 4 + Dh * 4
    scratch_b = bt * Dh * itemsize + 2 * bt * 4
    need = 2 * (d_tile + io_tile + resident) + scratch_b + (8 << 20)
    vmem_limit = int(min(max(need, 32 << 20), vmem_cap))

    kernel = functools.partial(_bilinear_attn_kernel, training=training,
                               num_l=num_l, tl=tl)

    out = pl.pallas_call(
        kernel,
        out_shape=jax.ShapeDtypeStruct((Bp, Lp), jnp.float32),
        grid_spec=pltpu.PrefetchScalarGridSpec(
            num_scalar_prefetch=0,
            grid=(num_b, num_l),
            in_specs=[
                pl.BlockSpec((bt, Qh), lambda i, l: (i, 0)),         # q batch tile
                pl.BlockSpec((Qh, Dh), lambda i, l: (0, 0)),         # W^T (resident)
                pl.BlockSpec((1, Dh), lambda i, l: (0, 0)),          # bias (resident)
                pl.BlockSpec((bt, tl, Dh), lambda i, l: (i, l, 0)),  # d_hiddens stream
                pl.BlockSpec((bt, tl), lambda i, l: (i, l)),         # mask tile
            ],
            out_specs=pl.BlockSpec((bt, Lp), lambda i, l: (i, 0)),   # resident over l
            scratch_shapes=[
                pltpu.VMEM((bt, 1, Dh), d_hiddens.dtype),   # Wy (streamed dtype)
                pltpu.VMEM((bt, 1), jnp.float32),           # running max
                pltpu.VMEM((bt, 1), jnp.float32),           # running sum(exp)
            ],
        ),
        compiler_params=pltpu.CompilerParams(
            dimension_semantics=("parallel", "arbitrary"),
            vmem_limit_bytes=vmem_limit,
        ),
    )(q_hidden, wT, b2, d_hiddens, mask)

    return out[:B, :L]


def _jax_reference(d_hiddens, q_hidden, d_mask, weight, bias):
    wy = q_hidden @ weight.T + bias
    xwy = jnp.einsum("bld,bd->bl", d_hiddens, wy)
    xwy = jnp.where(d_mask != 0, -jnp.inf, xwy)
    return wy, jax.nn.softmax(xwy, axis=1), jax.nn.log_softmax(xwy, axis=1)


if __name__ == "__main__":
    key = jax.random.PRNGKey(0)
    k1, k2, k3, k4, k5, k6, k7, k8 = jax.random.split(key, 8)

    # ---------------- config 1: aligned shapes, forced 2x2 tile grid ----------------
    B, L, Dh, Qh = 12, 256, 128, 256
    d_hiddens = jax.random.normal(k1, (B, L, Dh), dtype=jnp.float32)
    q_hidden = jax.random.normal(k2, (B, Qh), dtype=jnp.float32)
    weight = jax.random.normal(k3, (Dh, Qh), dtype=jnp.float32) * 0.1   # nn.Linear(Qh, Dh).weight
    bias = jax.random.normal(k4, (Dh,), dtype=jnp.float32) * 0.1        # nn.Linear(Qh, Dh).bias
    lengths = (jnp.arange(B) * 17 % (L - 32)) + 32
    d_mask = (jnp.arange(L)[None, :] >= lengths[:, None]).astype(jnp.int32)  # 1 = pad

    wy_ref, ref_soft, ref_log = _jax_reference(d_hiddens, q_hidden, d_mask, weight, bias)

    # Eval (softmax), forced batch tiles of 8 and L tiles of 128 -> online-softmax path.
    alpha = bilinear_attention(d_hiddens, q_hidden, d_mask, weight, bias,
                               training=False, batch_block=8, l_block=128)
    alpha = jax.block_until_ready(alpha)
    assert alpha.shape == (B, L)
    assert jnp.allclose(alpha, ref_soft, atol=1e-2), "softmax mismatch (tiled path)"
    # Exact divide in the finalize: rows sum to ~1.
    assert jnp.allclose(alpha.sum(axis=1), 1.0, atol=1e-4), "softmax rows do not sum to 1"

    # Training (log_softmax), same forced tiling. Masked positions are -inf in both.
    alpha_log = bilinear_attention(d_hiddens, q_hidden, d_mask, weight, bias,
                                   training=True, batch_block=8, l_block=128)
    alpha_log = jax.block_until_ready(alpha_log)
    diff = jnp.where(d_mask != 0, 0.0, alpha_log - ref_log)
    assert jnp.allclose(diff, 0.0, atol=5e-3), "log_softmax mismatch (tiled path)"

    # ---------------- config 2: ragged shapes exercising batch/L padding ------------
    B2, L2, Dh2, Qh2 = 5, 200, 128, 128
    d2 = jax.random.normal(k5, (B2, L2, Dh2), dtype=jnp.float32)
    q2 = jax.random.normal(k6, (B2, Qh2), dtype=jnp.float32)
    w2 = jax.random.normal(k7, (Dh2, Qh2), dtype=jnp.float32) * 0.1
    bb2 = jax.random.normal(k8, (Dh2,), dtype=jnp.float32) * 0.1
    lengths2 = (jnp.arange(B2) * 23 % (L2 - 32)) + 32
    m2 = (jnp.arange(L2)[None, :] >= lengths2[:, None]).astype(jnp.int32)
    _, ref_soft2, _ = _jax_reference(d2, q2, m2, w2, bb2)

    alpha2 = bilinear_attention(d2, q2, m2, w2, bb2,
                                training=False, batch_block=8, l_block=128)
    alpha2 = jax.block_until_ready(alpha2)
    assert alpha2.shape == (B2, L2)
    assert jnp.allclose(alpha2, ref_soft2, atol=1e-2), "softmax mismatch (ragged path)"
    assert jnp.allclose(alpha2.sum(axis=1), 1.0, atol=1e-4), "ragged rows do not sum to 1"

    # ---------------- config 3: bf16-streamed d_hiddens, auto single-block path -----
    d_bf = d_hiddens.astype(jnp.bfloat16)
    alpha_bf = bilinear_attention(d_bf, q_hidden, d_mask, weight, bias, training=False)
    alpha_bf = jax.block_until_ready(alpha_bf)
    # Reference with the same bf16 rounding on the streamed operands (f32 accumulate).
    xwy_bf = jnp.einsum("bld,bd->bl", d_bf.astype(jnp.float32),
                        wy_ref.astype(jnp.bfloat16).astype(jnp.float32))
    xwy_bf = jnp.where(d_mask != 0, -jnp.inf, xwy_bf)
    ref_bf = jax.nn.softmax(xwy_bf, axis=1)
    assert jnp.allclose(alpha_bf, ref_bf, atol=2e-2), "bf16 softmax mismatch vs reference"

    print("KERNEL_OK")
</pallas_src>

<mosaic_0001>
module attributes {stable_mosaic.version = 11 : i64} {
  func.func @_bilinear_attn_kernel(%arg0: i32, %arg1: i32, %arg2: memref<8x256xf32, #tpu.memory_space<vmem>>, %arg3: memref<256x128xf32, #tpu.memory_space<vmem>>, %arg4: memref<1x128xf32, #tpu.memory_space<vmem>>, %arg5: memref<8x128x128xf32, #tpu.memory_space<vmem>>, %arg6: memref<8x128xi32, #tpu.memory_space<vmem>>, %arg7: memref<8x256xf32, #tpu.memory_space<vmem>>, %arg8: memref<8x1x128xf32, #tpu.memory_space<vmem>>, %arg9: memref<8x1xf32, #tpu.memory_space<vmem>>, %arg10: memref<8x1xf32, #tpu.memory_space<vmem>>) attributes {dimension_semantics = [#tpu.dimension_semantics<parallel>, #tpu.dimension_semantics<arbitrary>], iteration_bounds = array<i64: 2, 2>, scalar_prefetch = 0 : i64, scratch_operands = 3 : i64, tpu.core_type = #tpu.core_type<tc>, window_params = [{transform_indices = @transform_0, window_bounds = array<i64: 8, 256>}, {pipeline_mode = #tpu.pipeline_mode<synchronous>, transform_indices = @transform_1, window_bounds = array<i64: 256, 128>}, {pipeline_mode = #tpu.pipeline_mode<synchronous>, transform_indices = @transform_2, window_bounds = array<i64: 1, 128>}, {transform_indices = @transform_3, window_bounds = array<i64: 8, 128, 128>}, {transform_indices = @transform_4, window_bounds = array<i64: 8, 128>}, {transform_indices = @transform_5, window_bounds = array<i64: 8, 256>}]} {
    %c0_i32 = arith.constant 0 : i32
    %0 = arith.cmpi eq, %arg1, %c0_i32 : i32
    %1 = arith.extui %0 : i1 to i32
    %c0_i32_0 = arith.constant 0 : i32
    %2 = arith.cmpi ne, %1, %c0_i32_0 : i32
    scf.if %2 {
      %c0_26 = arith.constant 0 : index
      %c0_27 = arith.constant 0 : index
      %43 = vector.load %arg2[%c0_26, %c0_27] : memref<8x256xf32, #tpu.memory_space<vmem>>, vector<8x256xf32>
      %c0_28 = arith.constant 0 : index
      %c0_29 = arith.constant 0 : index
      %44 = vector.load %arg3[%c0_28, %c0_29] : memref<256x128xf32, #tpu.memory_space<vmem>>, vector<256x128xf32>
      %cst_30 = arith.constant dense<0.000000e+00> : vector<8x128xf32>
      %45 = tpu.matmul %43, %44, %cst_30 {dimension_numbers = #tpu.dot_dimension_numbers<[1], [0], [0], [1], [0, 0, 1, 1], [], []>} : vector<8x256xf32>, vector<256x128xf32>, vector<8x128xf32> -> vector<8x128xf32>
      %c0_31 = arith.constant 0 : index
      %c0_32 = arith.constant 0 : index
      %46 = vector.load %arg4[%c0_31, %c0_32] : memref<1x128xf32, #tpu.memory_space<vmem>>, vector<1x128xf32>
      %47 = vector.broadcast %46 : vector<1x128xf32> to vector<8x128xf32>
      %48 = arith.addf %45, %47 : vector<8x128xf32>
      %49 = vector.shape_cast %48 : vector<8x128xf32> to vector<8x1x128xf32>
      %c0_33 = arith.constant 0 : index
      %c0_34 = arith.constant 0 : index
      %c0_35 = arith.constant 0 : index
      %50 = vector.load %arg8[%c0_33, %c0_34, %c0_35] : memref<8x1x128xf32, #tpu.memory_space<vmem>>, vector<8x1x128xf32>
      tpu.vector_store %arg8[%c0_33, %c0_34, %c0_35], %49 {strides = array<i32>} : memref<8x1x128xf32, #tpu.memory_space<vmem>>, vector<8x1x128xf32>,
      %cst_36 = arith.constant 0xFF800000 : f32
      %51 = vector.broadcast %cst_36 : f32 to vector<8x1xf32>
      %c0_37 = arith.constant 0 : index
      %c0_38 = arith.constant 0 : index
      %52 = vector.load %arg9[%c0_37, %c0_38] : memref<8x1xf32, #tpu.memory_space<vmem>>, vector<8x1xf32>
      tpu.vector_store %arg9[%c0_37, %c0_38], %51 {strides = array<i32>} : memref<8x1xf32, #tpu.memory_space<vmem>>, vector<8x1xf32>,
      %cst_39 = arith.constant 0.000000e+00 : f32
      %53 = vector.broadcast %cst_39 : f32 to vector<8x1xf32>
      %c0_40 = arith.constant 0 : index
      %c0_41 = arith.constant 0 : index
      %54 = vector.load %arg10[%c0_40, %c0_41] : memref<8x1xf32, #tpu.memory_space<vmem>>, vector<8x1xf32>
      tpu.vector_store %arg10[%c0_40, %c0_41], %53 {strides = array<i32>} : memref<8x1xf32, #tpu.memory_space<vmem>>, vector<8x1xf32>,
    } else {
    }
    %c0 = arith.constant 0 : index
    %c0_1 = arith.constant 0 : index
    %c0_2 = arith.constant 0 : index
    %3 = vector.load %arg8[%c0, %c0_1, %c0_2] : memref<8x1x128xf32, #tpu.memory_space<vmem>>, vector<8x1x128xf32>
    %c0_3 = arith.constant 0 : index
    %c0_4 = arith.constant 0 : index
    %c0_5 = arith.constant 0 : index
    %4 = vector.load %arg5[%c0_3, %c0_4, %c0_5] : memref<8x128x128xf32, #tpu.memory_space<vmem>>, vector<8x128x128xf32>
    "tpu.trace_start"() <{level = 10 : i32, message = "bqd,bkd->bqk"}> : () -> ()
    %cst = arith.constant dense<0.000000e+00> : vector<8x1x128xf32>
    %5 = tpu.matmul %3, %4, %cst {dimension_numbers = #tpu.dot_dimension_numbers<[2], [2], [1], [1], [0, 0, 0, 1, 1, 1], [0], [0]>} : vector<8x1x128xf32>, vector<8x128x128xf32>, vector<8x1x128xf32> -> vector<8x1x128xf32>
    "tpu.trace_stop"() : () -> ()
    %6 = vector.shape_cast %5 : vector<8x1x128xf32> to vector<8x128xf32>
    %c0_6 = arith.constant 0 : index
    %c0_7 = arith.constant 0 : index
    %7 = vector.load %arg6[%c0_6, %c0_7] : memref<8x128xi32, #tpu.memory_space<vmem>>, vector<8x128xi32>
    %c0_i32_8 = arith.constant 0 : i32
    %8 = vector.broadcast %c0_i32_8 : i32 to vector<8x128xi32>
    %9 = arith.cmpi ne, %7, %8 : vector<8x128xi32>
    %cst_9 = arith.constant 0xFF800000 : f32
    %10 = vector.broadcast %cst_9 : f32 to vector<8x128xf32>
    %11 = arith.select %9, %10, %6 : vector<8x128xi1>, vector<8x128xf32>
    %c128_i32 = arith.constant 128 : i32
    %12 = arith.muli %arg1, %c128_i32 : i32
    %13 = tpu.assume_multiple %12, 128 : i32
    %c0_10 = arith.constant 0 : index
    %14 = arith.index_cast %13 : i32 to index
    %15 = vector.load %arg7[%c0_10, %14] : memref<8x256xf32, #tpu.memory_space<vmem>>, vector<8x128xf32>
    tpu.vector_store %arg7[%c0_10, %14], %11 {strides = array<i32>} : memref<8x256xf32, #tpu.memory_space<vmem>>, vector<8x128xf32>,
    %c0_11 = arith.constant 0 : index
    %c0_12 = arith.constant 0 : index
    %16 = vector.load %arg9[%c0_11, %c0_12] : memref<8x1xf32, #tpu.memory_space<vmem>>, vector<8x1xf32>
    %cst_13 = arith.constant dense<0xFF800000> : vector<8xf32>
    %17 = vector.multi_reduction <maximumf>, %11, %cst_13 [1] : vector<8x128xf32> to vector<8xf32>
    %18 = vector.shape_cast %17 : vector<8xf32> to vector<8x1xf32>
    %19 = arith.maximumf %16, %18 : vector<8x1xf32>
    %cst_14 = arith.constant 0xFF800000 : f32
    %20 = vector.broadcast %cst_14 : f32 to vector<8x1xf32>
    %21 = arith.cmpf oeq, %19, %20 : vector<8x1xf32>
    %cst_15 = arith.constant 0.000000e+00 : f32
    %22 = vector.broadcast %cst_15 : f32 to vector<8x1xf32>
    %23 = arith.select %21, %22, %19 : vector<8x1xi1>, vector<8x1xf32>
    %cst_16 = arith.constant 0xFF800000 : f32
    %24 = vector.broadcast %cst_16 : f32 to vector<8x1xf32>
    %25 = arith.cmpf oeq, %16, %24 : vector<8x1xf32>
    %26 = arith.subf %16, %23 : vector<8x1xf32>
    %27 = math.exp %26 : vector<8x1xf32>
    %cst_17 = arith.constant 0.000000e+00 : f32
    %28 = vector.broadcast %cst_17 : f32 to vector<8x1xf32>
    %29 = arith.select %25, %28, %27 : vector<8x1xi1>, vector<8x1xf32>
    %c0_18 = arith.constant 0 : index
    %c0_19 = arith.constant 0 : index
    %30 = vector.load %arg10[%c0_18, %c0_19] : memref<8x1xf32, #tpu.memory_space<vmem>>, vector<8x1xf32>
    %31 = arith.mulf %30, %29 : vector<8x1xf32>
    %32 = vector.broadcast %23 : vector<8x1xf32> to vector<8x128xf32>
    %33 = arith.subf %11, %32 : vector<8x128xf32>
    %34 = math.exp %33 : vector<8x128xf32>
    %cst_20 = arith.constant dense<0.000000e+00> : vector<8xf32>
    %35 = vector.multi_reduction <add>, %34, %cst_20 [1] : vector<8x128xf32> to vector<8xf32>
    %36 = vector.shape_cast %35 : vector<8xf32> to vector<8x1xf32>
    %37 = arith.addf %31, %36 : vector<8x1xf32>
    %c0_21 = arith.constant 0 : index
    %c0_22 = arith.constant 0 : index
    %38 = vector.load %arg10[%c0_21, %c0_22] : memref<8x1xf32, #tpu.memory_space<vmem>>, vector<8x1xf32>
    tpu.vector_store %arg10[%c0_21, %c0_22], %37 {strides = array<i32>} : memref<8x1xf32, #tpu.memory_space<vmem>>, vector<8x1xf32>,
    %c0_23 = arith.constant 0 : index
    %c0_24 = arith.constant 0 : index
    %39 = vector.load %arg9[%c0_23, %c0_24] : memref<8x1xf32, #tpu.memory_space<vmem>>, vector<8x1xf32>
    tpu.vector_store %arg9[%c0_23, %c0_24], %19 {strides = array<i32>} : memref<8x1xf32, #tpu.memory_space<vmem>>, vector<8x1xf32>,
    %c1_i32 = arith.constant 1 : i32
    %40 = arith.cmpi eq, %arg1, %c1_i32 : i32
    %41 = arith.extui %40 : i1 to i32
    %c0_i32_25 = arith.constant 0 : i32
    %42 = arith.cmpi ne, %41, %c0_i32_25 : i32
    scf.if %42 {
      %c0_26 = arith.constant 0 : index
      %c0_27 = arith.constant 0 : index
      %43 = vector.load %arg7[%c0_26, %c0_27] : memref<8x256xf32, #tpu.memory_space<vmem>>, vector<8x256xf32>
      %c0_28 = arith.constant 0 : index
      %c0_29 = arith.constant 0 : index
      %44 = vector.load %arg9[%c0_28, %c0_29] : memref<8x1xf32, #tpu.memory_space<vmem>>, vector<8x1xf32>
      %45 = vector.broadcast %44 : vector<8x1xf32> to vector<8x256xf32>
      %46 = arith.subf %43, %45 : vector<8x256xf32>
      %47 = math.exp %46 : vector<8x256xf32>
      %c0_30 = arith.constant 0 : index
      %c0_31 = arith.constant 0 : index
      %48 = vector.load %arg10[%c0_30, %c0_31] : memref<8x1xf32, #tpu.memory_space<vmem>>, vector<8x1xf32>
      %49 = vector.broadcast %48 : vector<8x1xf32> to vector<8x256xf32>
      %50 = arith.divf %47, %49 : vector<8x256xf32>
      %c0_32 = arith.constant 0 : index
      %c0_33 = arith.constant 0 : index
      %51 = vector.load %arg7[%c0_32, %c0_33] : memref<8x256xf32, #tpu.memory_space<vmem>>, vector<8x256xf32>
      tpu.vector_store %arg7[%c0_32, %c0_33], %50 {strides = array<i32>} : memref<8x256xf32, #tpu.memory_space<vmem>>, vector<8x256xf32>,
    } else {
    }
    return
  }
  func.func @transform_0(%arg0: i32, %arg1: i32) -> (i32, i32) {
    %c0_i32 = arith.constant 0 : i32
    %c0_i32_0 = arith.constant 0 : i32
    return %arg0, %c0_i32 : i32, i32
  }
  func.func @transform_1(%arg0: i32, %arg1: i32) -> (i32, i32) {
    %c0_i32 = arith.constant 0 : i32
    %c0_i32_0 = arith.constant 0 : i32
    %c0_i32_1 = arith.constant 0 : i32
    return %c0_i32, %c0_i32_0 : i32, i32
  }
  func.func @transform_2(%arg0: i32, %arg1: i32) -> (i32, i32) {
    %c0_i32 = arith.constant 0 : i32
    %c0_i32_0 = arith.constant 0 : i32
    %c0_i32_1 = arith.constant 0 : i32
    return %c0_i32, %c0_i32_0 : i32, i32
  }
  func.func @transform_3(%arg0: i32, %arg1: i32) -> (i32, i32, i32) {
    %c0_i32 = arith.constant 0 : i32
    %c0_i32_0 = arith.constant 0 : i32
    return %arg0, %arg1, %c0_i32 : i32, i32, i32
  }
  func.func @transform_4(%arg0: i32, %arg1: i32) -> (i32, i32) {
    %c0_i32 = arith.constant 0 : i32
    return %arg0, %arg1 : i32, i32
  }
  func.func @transform_5(%arg0: i32, %arg1: i32) -> (i32, i32) {
    %c0_i32 = arith.constant 0 : i32
    %c0_i32_0 = arith.constant 0 : i32
    return %arg0, %c0_i32 : i32, i32
  }
}

</mosaic_0001>

<bundles_post_ra>
// kernel: tpu_custom_call.1
= control target key start
LH: loop header
LB: loop body
LE: loop exit
PB: predicated region body
PF: predicated region fallthrough
CT: control target
= control target key end

     0   :  { %s3045_s0 = inlined_call_operand.hbm [shape: f32[16,256], index: 0, kind: input, shape index: {}]   ;;  %s3046_s1 = inlined_call_operand.hbm [shape: f32[256,128], index: 1, kind: input, shape index: {}]   ;;  %s3047_s2 = inlined_call_operand.hbm [shape: f32[1,128], index: 2, kind: input, shape index: {}]   ;;  %s3048_s3 = inlined_call_operand.hbm [shape: f32[16,256,128], index: 3, kind: input, shape index: {}]   ;;  %s3049_s4 = inlined_call_operand.hbm [shape: s32[16,256], index: 4, kind: input, shape index: {}]   ;;  %s3050_s5 = inlined_call_operand.hbm [shape: f32[16,256], index: 5, kind: output, shape index: {}]  }
   0x1   :  { %3065 = sst [smem:[#allocation31_spill]] %s3045_s0 }
   0x2   :  { %3066 = sst [smem:[#allocation32_spill]] %s3046_s1 }
   0x3   :  { %3067 = sst [smem:[#allocation33_spill]] %s3047_s2 }
   0x4   :  { %3068 = sst [smem:[#allocation34_spill]] %s3048_s3 }
   0x5   :  { %3069 = sst [smem:[#allocation35_spill]] %s3050_s5 }
   0x6   :  { %10 = vsyncpa [#allocation6], 0 }
   0x7   :  { %12 = vsyncpa [#allocation6 + $0x1], 0 }
   0x8   :  { %13 = vsyncpa [#allocation9], 0 }
   0x9   :  { %14 = vsyncpa [#allocation12], 0 }
   0xa   :  { %16 = vsyncpa [#allocation12 + $0x1], 0 }
   0xb   :  { %17 = vsyncpa [#allocation7], 0 }
   0xc   :  { %19 = vsyncpa [#allocation7 + $0x1], 0  ;;  %s2464_s18 = smov 0   ;;  %s2466_s19 = smov 0  }
   0xd   :  { %s2468_s20 = smov 0   ;;  %s2470_s21 = smov 0  }
   0xe   :  { %s2472_s22 = smov 0   ;;  %s2474_s23 = smov 0  }
   0xf   :  { %s2476_s24 = smov 0   ;;  %s2478_s25 = smov 0  }
  0x10   :  { %s2480_s26 = smov 0   ;;  %s2482_s27 = smov 0  }
  0x11   :  { %s2484_s28 = smov 0  }
  0x12 LB: > { %3070 = sst [smem:[#allocation22_spill]] %s2384_s21  ;;  %s2520_s29 = sadd.s32 4294967295, %s2412_s28   ;;  %s2412_s28 = sphi %s2484_s28, %s25_s28   ;;  %s2408_s27 = sphi %s2482_s27, %s3117_s27   ;;  %s2404_s26 = sphi %s2480_s26, %s3116_s26   ;;  %s2400_s25 = sphi %s2478_s25, %s3115_s25   ;;  %s2396_s24 = sphi %s2476_s24, %s3114_s24   ;;  %s2392_s23 = sphi %s2474_s23, %s3106_s23   ;;  %s2388_s22 = sphi %s2472_s22, %s3113_s22   ;;  %s2384_s21 = sphi %s2470_s21, %s3112_s21   ;;  %s2380_s20 = sphi %s2468_s20, %s3111_s20   ;;  %s2376_s19 = sphi %s2466_s19, %s3110_s19   ;;  %s2372_s18 = sphi %s2464_s18, %s3109_s18  }
  0x13   : > { %3071 = sst [smem:[#allocation23_spill]] %s2392_s23  ;;  %s1531_s30 = sadd.s32 4294967294, %s2412_s28  }
  0x14   : > { %3072 = sst [smem:[#allocation24_spill]] %s2400_s25  ;;  %s34_s6 = sadd.s32 1, %s2404_s26 }
  0x15   : > { %s37_s7 = sadd.s32 1, %s2408_s27  ;;  %p35_p0 = scmp.ge.s32.totalorder %s34_s6, 2 }
  0x16   : > { %s44_s8 = sadd.s32 1, %s2392_s23  ;;  %p51_p1 = scmp.ne.s32.totalorder %s2392_s23, %s2388_s22 }
  0x17   : > { %p52_p2 = scmp.eq.s32.totalorder %s2412_s28, 0  ;;  %s3119_s6 = smov (%p35_p0, %s34_s6), 0 }
  0x18   : > { %3073 = sst [smem:[#allocation25_spill]] %s3119_s6  ;;  %s3121_s7 = smov (!%p35_p0, %s37_s7), %s2408_s27 }
  0x19   : > { %p2537_p3 = por %p52_p2, %p51_p1  ;;  %p3052_p4 = scmp.ne.s32.totalorder %s2388_s22, %s2384_s21 }
  0x1a   : > { %p39_p5 = scmp.ge.s32.totalorder %s3121_s7, 2  ;;  %p3058_p6 = scmp.eq.s32.totalorder %s2520_s29, 0 }
  0x1b   : > { %s110_s10 = ssub.s32 %s2404_s26, %s3119_s6  ;;  %s114_s11 = sadd.s32 1, %s2380_s20 }
  0x1c   : > { %s3123_s7 = smov (%p39_p5, %s3121_s7), 0  ;;  %p2554_p7 = por %p3058_p6, %p3052_p4 }
  0x1d   : > { %3075 = sst [smem:[#allocation26_spill]] %s3123_s7  ;;  %p121_p8 = scmp.ne.s32.totalorder %s2380_s20, %s2376_s19 }
  0x1e   : > { %s3076_s12 = scalar_select %p2554_p7, 1, 0 }
  0x1f   : > { %s41_s13 = ssub.s32 %s2408_s27, %s3123_s7  ;;  %p127_p9 = scmp.ne.s32.totalorder %s2376_s19, %s2372_s18 }
  0x20   : > { %p42_p10 = scmp.eq.s32.totalorder %s41_s13, 0  ;;  %s111_s14 = sor.u32 %s110_s10, %s41_s13 }
  0x21   : > { %p112_p11 = scmp.eq.s32.totalorder %s111_s14, 0  ;;  %p2566_p12 = por %p121_p8, %p52_p2 }
  0x22   : > { %s2571_s16 = scalar_select %p42_p10, %s2392_s23, %s44_s8  }
  0x23   : > { %s3077_s15 = scalar_select %p2566_p12, 1, 0 }
  0x24   : > { %3078 = sst [smem:[#allocation27_spill]] %s2571_s16  ;;  %p2578_p13 = por %p127_p9, %p3058_p6 }
  0x25   : > { %s2574_s17 = scalar_select %p112_p11, %s2380_s20, %s114_s11  }
  0x26   : > { %p179_p0 = scmp.eq.s32.totalorder %s2520_s29, 3  ;;  %p185_p5 = scmp.eq.s32.totalorder %s1531_s30, 3 }
  0x27   : > { %3079 = sst [smem:[#allocation28_spill]] %s2574_s17  ;;  %p1532_p4 = scmp.ge.s32.totalorder %s2412_s28, 1 }
  0x28   : > { %p2587_p7 = por %p179_p0, %p51_p1  ;;  %p192_p2 = scmp.lt.s32.totalorder %s2412_s28, 5 }
  0x29   : > { %p3083_p8 = scmp.ne.s32.totalorder %s2388_s22, %s2384_s21  ;;  %s2414_s11 = smov [#allocation8]  }
  0x2a   : > { %s3081_s18 = scalar_select %p2587_p7, 1, 0 }
  0x2b   : > { %p2595_p12 = por %p185_p5, %p3083_p8  ;;  %p2599_p10 = pnand %p1532_p4, %p192_p2 }
  0x2c   : > { %3082 = sst [smem:[#allocation29_spill]] %s3081_s18  ;;  %s204_s13 = sshll.u32 %s2414_s11, 4  ;;  %s205_s13 = int_to_ptr.vmem [resolvable:$true] %s204_s13 }
  0x2d   : > { %s3084_s8 = scalar_select %p2595_p12, 1, 0 }
  0x2e   : > { %p2047_p9 = pneg %p2599_p10  ;;  %s2415_s14 = smov [#allocation10]  }
  0x2f   : > { %3085 = sst [smem:[#allocation30_spill]] %s3084_s8  ;;  %s218_s7 = sshll.u32 %s2415_s14, 4  ;;  %s219_s7 = int_to_ptr.vmem [resolvable:$true] %s218_s7 }
  0x30   : > { %p2607_p1 = pnand %p2047_p9, %p3058_p6  ;;  %s2191_s16 = scalar_lea.vmem %s205_s13, 4096 }
  0x31   : > { %p2192_p11 = scmp.ne.s32.totalorder %s205_s13, %s2191_s16  ;;  %p2199_p2 = scmp.lt.s32.totalorder %s205_s13, %s205_s13 }
  0x32   : > { %p2182_p4 = pneg %p2607_p1  ;;  %p2200_p8 = scmp.lt.s32.totalorder %s2191_s16, %s2191_s16 }
  0x34   : > { %p2194_p0 = pnand %p2192_p11, %p2182_p4  ;;  %p2201_p12 = por %p2200_p8, %p2199_p2 }
  0x36   : > { %p2195_p5 = pneg %p2194_p0 }
  0x38   : > { %p2202_p9 = pnand %p2201_p12, %p2195_p5 }
  0x3a   : > { %2205 = shalt.err (!%p2202_p9)
}
  0x3b   : > { %s2416_s11 = smov 128   ;;  %s2417_s17 = smov 8  }
  0x3c   : > { %s3088_s1 = sld [smem:[#allocation32_spill]]  ;;  %s2217_s21 = scalar_lea.vmem %s219_s7, 16 }
  0x3d   : > { %p2218_p6 = scmp.ne.s32.totalorder %s219_s7, %s2217_s21  ;;  %s2224_s5 = scalar_lea.vmem %s219_s7, 32 }
  0x3e   : > { %p2225_p7 = scmp.lt.s32.totalorder %s219_s7, %s219_s7  ;;  %p2226_p2 = scmp.lt.s32.totalorder %s2224_s5, %s2217_s21 }
  0x3f   : > { %p2220_p11 = pnand %p2218_p6, %p2182_p4 }
  0x40   : > { %p2227_p12 = por %p2226_p2, %p2225_p7 }
  0x41   : > { %p2221_p0 = pneg %p2220_p11 }
  0x42   : > { %2050 = dma.hbm_to_vmem [thread:$0]  (!%p2607_p1), %s3088_s1, 4096, %s205_s13, [#allocation9], %s2416_s11, %s2416_s11, %s2417_s17  }
  0x43   : > { %p2228_p5 = pnand %p2227_p12, %p2221_p0 }
  0x45   : > { %2231 = shalt.err (!%p2228_p5)
}
  0x46   : > { %s3089_s2 = sld [smem:[#allocation33_spill]]  ;;  %p1535_p8 = scmp.ge.s32.totalorder %s2412_s28, 4 }
  0x47   : > { %s229_s17 = sand.u32 (!%p1535_p8), 1, %s2392_s23   ;;  %s1570_s8 = sshll.u32 (!%p1535_p8), %s2408_s27, 8 }
  0x48   : > { %225 = sbr.rel (%p1535_p8) target bundleno = 121 (0x79), region = 24  ;;  %s1536_s13 = sshll.u32 (!%p1535_p8), %s229_s17, 4 }
  0x49   : > { %s3090_s0 = sld [smem:[#allocation31_spill]] (!%p1535_p8)  ;;  %s233_s14 = scalar_lea.vmem (!%p1535_p8), [#allocation5], %s1536_s13 }
  0x4a   : > { %s241_s1 = sshll.u32 (!%p1535_p8), %s233_s14, 4  ;;  %s230_s30 = scalar_lea.sflag (!%p1535_p8), [#allocation6], %s229_s17  ;;  %s242_s1 = int_to_ptr.vmem [resolvable:$true] %s241_s1 }
  0x4b   : > { %s2244_s25 = scalar_lea.vmem (!%p1535_p8), %s242_s1, 256 }
  0x4c   : > { %2053 = dma.hbm_to_vmem [thread:$0]  (!%p2607_p1), %s3089_s2, 16, %s219_s7, [#allocation9]  }
  0x4d   : > { %p2245_p6 = scmp.ne.s32.totalorder %s242_s1, %s2244_s25  ;;  %s2418_s7 = smov [#allocation5]  }
  0x4e   : > { %s2248_s18 = sshll.u32 %s2418_s7, 4  ;;  %s2249_s18 = int_to_ptr.vmem [resolvable:$false] %s2248_s18 }
  0x4f   : > { %s239_s21 = scalar_lea.hbm %s3090_s0, %s1570_s8  ;;  %p2246_p7 = pnand %p2245_p6, %p2537_p3 }
  0x50   : > { %s2250_s16 = scalar_lea.vmem %s2249_s18, 512  ;;  %p2251_p4 = scmp.lt.s32.totalorder %s242_s1, %s2249_s18 }
  0x51   : > { %p2247_p1 = pneg %p2246_p7  ;;  %p2252_p9 = scmp.lt.s32.totalorder %s2250_s16, %s2244_s25 }
  0x53   : > { %p2253_p11 = por %p2252_p9, %p2251_p4 }
  0x55   : > { %p2254_p0 = pnand %p2253_p11, %p2247_p1 }
  0x57   : > { %2257 = shalt.err (!%p2254_p0)
}
  0x58   : > { %2028 = dma.hbm_to_vmem [thread:$0]  (%p2537_p3), %s239_s21, 256, %s242_s1, %s230_s30  }
  0x59   : > { %s3063_s17 = sand.u32 1, %s2380_s20   ;;  %s248_s13 = sand.u32 1, %s2412_s28  }
  0x5a   : > { %s1539_s11 = sshll.u32 %s3063_s17, 10  ;;  %s1541_s25 = sshll.u32 %s2404_s26, 4 }
  0x5b   : > { %s259_s5 = sadd.s32 %s1570_s8, %s1541_s25  ;;  %s252_s14 = scalar_lea.vmem [#allocation11], %s1539_s11 }
  0x5c   : > { %s274_s7 = sshll.u32 %s252_s14, 4  ;;  %s1543_s1 = sshll.u32 %s259_s5, 7  ;;  %s275_s7 = int_to_ptr.vmem [resolvable:$true] %s274_s7 }
  0x5d   : > { %p3091_p3 = scmp.ne.s32.totalorder %s3077_s15, 0  ;;  %s2419_s21 = smov 4096  }
  0x5e   : > { %s2420_s18 = smov 2048   ;;  %s2421_s16 = smov 16  }
  0x5f   : > { %s2029_s9 = scalar_select %p3091_p3, [#allocation0], [#allocation17] }
  0x60   : > { %2030 = sst [smem:[#allocation16]] (%p3091_p3), %s2419_s21  ;;  %s2422_s8 = smov 128  }
  0x61   : > { %s266_s30 = sld [smem:[%s2029_s9]]   ;;  %s2423_s14 = smov 8  }
  0x62   : > { %2031 = sst [smem:[#allocation16 + $0x1]] (%p3091_p3), %s2420_s18  ;;  %s249_s17 = scalar_lea.sflag [#allocation12], %s248_s13 }
  0x63   : > { %2032 = sst [smem:[#allocation16 + $0x2]] (%p3091_p3), %s2421_s16  ;;  %s2424_s18 = smov 131072  }
  0x64   : > { %2033 = sst [smem:[#allocation16 + $0x3]] (%p3091_p3), %s2422_s8  ;;  %s3093_s16 = sand.u32 1, %s2380_s20  }
  0x65   : > { %s3092_s3 = sld [smem:[#allocation34_spill]]  ;;  %s1546_s0 = sshll.u32 %s3093_s16, 3 }
  0x66   : > { %2034 = sst [smem:[#allocation16 + $0x4]] (%p3091_p3), %s2422_s8  ;;  %s1547_s2 = sshll.u32 %s2408_s27, 1 }
  0x67   : > { %2035 = sst [smem:[#allocation16 + $0x5]] (%p3091_p3), %s2423_s14  ;;  %s1544_s9 = sshll.u32 %s266_s30, 26 }
  0x68   : > { %s1545_s21 = sadd.s32 134217728, %s1544_s9  ;;  %s306_s11 = sadd.s32 %s2404_s26, %s1547_s2 }
  0x69   : > { %s301_s25 = scalar_lea.vmem [#allocation13], %s1546_s0 }
  0x6a   : > { %s310_s8 = sshll.u32 %s301_s25, 4  ;;  %s311_s8 = int_to_ptr.vmem [resolvable:$true] %s310_s8 }
  0x6b   : > { %s261_s5 = scalar_lea.hbm %s3092_s3, %s1543_s1  ;;  %s1548_s1 = sshll.u32 %s306_s11, 7 }
  0x6c   : > { %2036 = dma.general (%p3091_p3), %s261_s5, 16384, %s275_s7, %s249_s17, %s2424_s18, [#allocation16], %s1545_s21, 0  }
  0x6d   : > { %s308_s30 = scalar_lea.hbm %s3049_s4, %s1548_s1  ;;  %s2270_s13 = scalar_lea.vmem %s311_s8, 128 }
  0x6e   : > { %p2271_p2 = scmp.ne.s32.totalorder %s311_s8, %s2270_s13  ;;  %s2425_s7 = smov [#allocation13]  }
  0x6f   : > { %s2274_s5 = sshll.u32 %s2425_s7, 4  ;;  %s2275_s5 = int_to_ptr.vmem [resolvable:$false] %s2274_s5 }
  0x70   : > { %p2272_p12 = pnand %p2271_p2, %p3091_p3  ;;  %s2276_s14 = scalar_lea.vmem %s2275_s5, 256 }
  0x71   : > { %p2277_p8 = scmp.lt.s32.totalorder %s311_s8, %s2275_s5  ;;  %p2278_p6 = scmp.lt.s32.totalorder %s2276_s14, %s2270_s13 }
  0x72   : > { %p2273_p5 = pneg %p2272_p12 }
  0x73   : > { %p2279_p7 = por %p2278_p6, %p2277_p8 }
  0x75   : > { %p2280_p1 = pnand %p2279_p7, %p2273_p5 }
  0x77   : > { %2283 = shalt.err (!%p2280_p1)
}
  0x78   : > { %2037 = dma.hbm_to_vmem [thread:$0]  (%p3091_p3), %s308_s30, 128, %s311_s8, %s249_s17  }
  0x79 PF: > { %319 = sbr.rel (%p2599_p10) target bundleno = 1441 (0x5a1), region = 40  ;;  %s2677_s0 = sand.u32 (!%p2599_p10), 1, %s2388_s22  }
  0x7a   : > { %s1550_s2 = sshll.u32 (!%p2599_p10), %s2677_s0, 4  ;;  %s322_s3 = scalar_lea.sflag (!%p2599_p10), [#allocation6], %s2677_s0 }
  0x7b   : > { %s2681_s23 = scalar_lea.vmem (!%p2599_p10), [#allocation5], %s1550_s2  ;;  %p3094_p4 = scmp.ne.s32.totalorder (!%p2599_p10), %s3076_s12, 0 }
  0x7e   : > { %2355 = dma.done.wait (%p3094_p4), %s322_s3, 256  }
  0x7f   : > { %2357 = vsyncadd (%p3094_p4), %s322_s3, 4294967040  ;;  %p3095_p9 = scmp.eq.s32.totalorder %s2520_s29, 0 }
  0x81   : > { %2359 = dma.done.wait (%p3095_p9), [#allocation9], 4112   ;;  %p3096_p10 = pmov %p3095_p9 }
  0x82   : > { %s338_s15 = sand.u32 1, %s2520_s29   ;;  %s340_s10 = sand.u32 1, %s2376_s19  }
  0x83   : > { %2361 = vsyncadd (%p3096_p10), [#allocation9], 4294963184  ;;  %s1553_s17 = sshll.u32 %s340_s10, 10  ;;  %s339_s9 = scalar_lea.sflag [#allocation12], %s338_s15 }
  0x84   : > { %s2693_s21 = scalar_lea.vmem [#allocation11], %s1553_s17 }
  0x85   : > { %2363 = dma.done.wait (%p2578_p13), %s339_s9, 16512  }
  0x86   : > { %2365 = vsyncadd (%p2578_p13), %s339_s9, 4294950784  ;;  %s2699_s12 = sshll.u32 %s340_s10, 3  ;;  %s2702_s16 = scalar_lea.vmem [#allocation14], %s1550_s2 }
  0x87   : > { %s351_s18 = scalar_lea.vmem [#allocation13], %s2699_s12  ;;  %p1556_p11 = scmp.ne.s32.totalorder %s2396_s24, 0 }
  0x89   : > { %393 = sbr.rel (%p1556_p11) target bundleno = 385 (0x181), region = 64 }
  0x8e   : > { %v427_v0 = vld [vmem:[#allocation8 + $0xf8] sm:$0xff]  ;;  %v426_v2 = vld [vmem:[#allocation8 + $0xf0] sm:$0xff]  ;;  %v425_v4 = vld [vmem:[#allocation8 + $0xe8] sm:$0xff]  ;;  %vm571_vm0 = vcmask 7168   ;;  %v2426_v34 = vmov -inf   ;;  %v2427_v35 = vmov 0.0   ;;  %v510_v38 = vlaneseq }
  0x8f   : > { %v411_v1 = vld [vmem:[#allocation8 + $0x78] sm:$0xff]  ;;  %1573 = vmatprep.subr.mxu0 %v427_v0  ;;  %v410_v3 = vld [vmem:[#allocation8 + $0x70] sm:$0xff]  ;;  %v409_v5 = vld [vmem:[#allocation8 + $0x68] sm:$0xff]  ;;  %572 = vst.msk [vmem:[#allocation3] sm:$0xff] %vm571_vm0, %v2426_v34  ;;  %v2428_v36 = vmov 1966171168  }
  0x90   : > { %1574 = vmatpush3.msra.mxu0 %v411_v1  ;;  %v424_v6 = vld [vmem:[#allocation8 + $0xe0] sm:$0xff]  ;;  %v423_v8 = vld [vmem:[#allocation8 + $0xd8] sm:$0xff]  ;;  %v422_v10 = vld [vmem:[#allocation8 + $0xd0] sm:$0xff]  ;;  %573 = vst.msk [vmem:[#allocation4] sm:$0xff] %vm571_vm0, %v2427_v35  ;;  %v508_v37 = vunpack.c.l.s4 %v2428_v36  ;;  %v511_v40 = vshrl.u32 %v510_v38, 7 }
  0x91   : > { %1575 = vmatprep.subr.mxu0 %v426_v2  ;;  %v408_v7 = vld [vmem:[#allocation8 + $0x60] sm:$0xff]  ;;  %v407_v9 = vld [vmem:[#allocation8 + $0x58] sm:$0xff]  ;;  %v406_v11 = vld [vmem:[#allocation8 + $0x50] sm:$0xff] }
  0x92   : > { %1576 = vmatpush3.msra.mxu0 %v410_v3  ;;  %v421_v12 = vld [vmem:[#allocation8 + $0xc8] sm:$0xff]  ;;  %v420_v15 = vld [vmem:[#allocation8 + $0xc0] sm:$0xff]  ;;  %v419_v17 = vld [vmem:[#allocation8 + $0xb8] sm:$0xff]  ;;  %v509_v39 = vunpack.c.0.s8 %v508_v37 }
  0x93   : > { %1577 = vmatprep.subr.mxu0 %v425_v4  ;;  %v395_v13 = vld [vmem:[%s2681_s23 + $0x8] sm:$0xff]  ;;  %v404_v16 = vld [vmem:[#allocation8 + $0x40] sm:$0xff]  ;;  %v418_v19 = vld [vmem:[#allocation8 + $0xb0] sm:$0xff] }
  0x94   : > { %1578 = vmatpush3.msra.mxu0 %v409_v5  ;;  %v405_v14 = vld [vmem:[#allocation8 + $0x48] sm:$0xff]  ;;  %499 = vmatprep.mubr.f32.mxu0 %v395_v13  ;;  %v403_v18 = vld [vmem:[#allocation8 + $0x38] sm:$0xff]  ;;  %v402_v20 = vld [vmem:[#allocation8 + $0x30] sm:$0xff]  ;;  %v512_v45 = vsub.s32 %v509_v39, %v511_v40 }
  0x95   : > { %1579 = vmatprep.subr.mxu0 %v424_v6  ;;  %v417_v21 = vld [vmem:[#allocation8 + $0xa8] sm:$0xff]  ;;  %v416_v23 = vld [vmem:[#allocation8 + $0xa0] sm:$0xff]  ;;  %v415_v25 = vld [vmem:[#allocation8 + $0x98] sm:$0xff] }
  0x96   : > { %1580 = vmatpush3.msra.mxu0 %v408_v7  ;;  %v401_v22 = vld [vmem:[#allocation8 + $0x28] sm:$0xff]  ;;  %v400_v24 = vld [vmem:[#allocation8 + $0x20] sm:$0xff]  ;;  %v399_v26 = vld [vmem:[#allocation8 + $0x18] sm:$0xff] }
  0x97   : > { %1581 = vmatprep.subr.mxu0 %v423_v8  ;;  %v414_v27 = vld [vmem:[#allocation8 + $0x90] sm:$0xff]  ;;  %v413_v29 = vld [vmem:[#allocation8 + $0x88] sm:$0xff]  ;;  %v412_v31 = vld [vmem:[#allocation8 + $0x80] sm:$0xff] }
  0x98   : > { %1582 = vmatpush3.msra.mxu0 %v407_v9  ;;  %v398_v28 = vld [vmem:[#allocation8 + $0x10] sm:$0xff]  ;;  %v397_v30 = vld [vmem:[#allocation8 + $0x8] sm:$0xff]  ;;  %v396_v32 = vld [vmem:[#allocation8] sm:$0xff] }
  0x99   : > { %1583 = vmatprep.subr.mxu0 %v422_v10  ;;  %v394_v33 = vld [vmem:[%s2681_s23] sm:$0xff] }
  0x9a   : > { %1584 = vmatpush3.msra.mxu0 %v406_v11  ;;  %v1557_v42 = vld [vmem:[#allocation10] ss:$0 sm:$0xff] }
  0x9b   : > { %1585 = vmatprep.subr.mxu0 %v421_v12 }
  0x9c   : > { %1586 = vmatpush3.msra.mxu0 %v405_v14 }
  0x9d   : > { %1587 = vmatprep.subr.mxu0 %v420_v15 }
  0x9e   : > { %1588 = vmatpush3.msra.mxu0 %v404_v16 }
  0x9f   : > { %1589 = vmatprep.subr.mxu0 %v419_v17 }
  0xa0   : > { %1590 = vmatpush3.msra.mxu0 %v403_v18 }
  0xa1   : > { %1591 = vmatprep.subr.mxu0 %v418_v19 }
  0xa2   : > { %1592 = vmatpush3.msra.mxu0 %v402_v20 }
  0xa3   : > { %1593 = vmatprep.subr.mxu0 %v417_v21 }
  0xa4   : > { %1594 = vmatpush3.msra.mxu0 %v401_v22 }
  0xa5   : > { %1595 = vmatprep.subr.mxu0 %v416_v23 }
  0xa6   : > { %1596 = vmatpush3.msra.mxu0 %v400_v24 }
  0xa7   : > { %1597 = vmatprep.subr.mxu0 %v415_v25 }
  0xa8   : > { %1598 = vmatpush3.msra.mxu0 %v399_v26 }
  0xa9   : > { %1599 = vmatprep.subr.mxu0 %v414_v27 }
  0xaa   : > { %1600 = vmatpush3.msra.mxu0 %v398_v28 }
  0xab   : > { %1601 = vmatprep.subr.mxu0 %v413_v29 }
  0xac   : > { %1602 = vmatpush3.msra.mxu0 %v397_v30 }
  0xad   : > { %1603 = vmatprep.subr.mxu0 %v412_v31 }
  0xae   : > { %1604 = vmatpush3.msra.mxu0 %v396_v32 }
  0xaf   : > { %500 = vmatmul.mubr.f32.vlgmr.msra.gmra.mxu0 %v394_v33 }
 0x16f   : > { %v1605_v41 = vpop.f32.mrf.mxu0 }
 0x171   : > { %v1606_v43 = vpop.f32.mrf.mxu0 }
 0x172   : > { %v1607_v44 = vadd.f32 %v1606_v43, %v1605_v41 }
 0x174   : > { %v502_v46 = vadd.f32 %v1607_v44, %v1557_v42 }
 0x176   : > { %v506_v47 = vcombine.high %v502_v46, %v502_v46  ;;  %v513_v48 = vrot.slane %v502_v46, %v512_v45 }
 0x178   : > { %v520_v49 = vrot.slane %v506_v47, %v512_v45  ;;  %v521_v50 = vcombine.high %v513_v48, %v513_v48  ;;  %v529_v51 = vrot.slane %v513_v48, %v512_v45  ;;  %1558 = vst.sshfl [vmem:[#allocation2] sm:$0x1 pattern:$0x73625140] %v513_v48 }
 0x17a   : > { %v522_v52 = vcombine.high %v520_v49, %v520_v49  ;;  %v536_v53 = vrot.slane %v520_v49, %v512_v45  ;;  %v543_v54 = vrot.slane %v521_v50, %v512_v45  ;;  %v551_v55 = vcombine.high %v529_v51, %v529_v51  ;;  %1559 = vst.sshfl [vmem:[#allocation2 + $0x1] sm:$0x1 pattern:$0x73625140] %v521_v50 }
 0x17b   : > { %1560 = vst.sshfl [vmem:[#allocation2 + $0x4] sm:$0x1 pattern:$0x73625140] %v520_v49 }
 0x17c   : > { %v550_v56 = vrot.slane %v522_v52, %v512_v45  ;;  %v552_v57 = vcombine.high %v536_v53, %v536_v53  ;;  %v553_v58 = vcombine.high %v543_v54, %v543_v54  ;;  %565 = vst [vmem:[#allocation2 + $0x2] sm:$0x1] %v551_v55  ;;  %1561 = vst.sshfl [vmem:[#allocation2 + $0x5] sm:$0x1 pattern:$0x73625140] %v522_v52 }
 0x17e   : > { %v554_v59 = vcombine.high %v550_v56, %v550_v56  ;;  %566 = vst [vmem:[#allocation2 + $0x3] sm:$0x1] %v553_v58  ;;  %569 = vst [vmem:[#allocation2 + $0x6] sm:$0x1] %v552_v57 }
 0x180   : > { %570 = vst [vmem:[#allocation2 + $0x7] sm:$0x1] %v554_v59 }
 0x181 PF: > { %v597_v60 = vld [vmem:[%s2693_s21 + $0x78] sm:$0xff]  ;;  %v2429_v62 = vmov 0.0   ;;  %v596_v63 = vld [vmem:[%s2693_s21 + $0x70] sm:$0xff]  ;;  %vm2430_vm1 = vmmov 0   ;;  %v595_v1 = vld [vmem:[%s2693_s21 + $0x68] sm:$0xff]  ;;  %vm1281_vm2 = vcmask 1041409  }
 0x182   : > { %v613_v61 = vld [vmem:[%s2693_s21 + $0xf8] sm:$0xff]  ;;  %1744 = vmatprep.subr.mxu0 %v2429_v62  ;;  %1779 = vmatprep.subr.mxu1 %v2429_v62  ;;  %v612_v0 = vld [vmem:[%s2693_s21 + $0xf0] sm:$0xff]  ;;  %v611_v2 = vld [vmem:[%s2693_s21 + $0xe8] sm:$0xff]  ;;  %vm1284_vm3 = vcmask 1042434   ;;  %vm1287_vm4 = vcmask 1043459   ;;  %s1562_s29 = sshll.u32 %s2396_s24, 7 }
 0x183   : > { %1745 = vmatpush3.xpose.msra.mxu0 %v597_v60  ;;  %1780 = vmatpush3.xpose.msra.mxu1 %v613_v61  ;;  %v594_v3 = vld [vmem:[%s2693_s21 + $0x60] sm:$0xff]  ;;  %v593_v5 = vld [vmem:[%s2693_s21 + $0x58] sm:$0xff]  ;;  %v592_v7 = vld [vmem:[%s2693_s21 + $0x50] sm:$0xff]  ;;  %vm1290_vm5 = vcmask 1044484   ;;  %s1304_s6 = sshra.s32 %s1562_s29, 7  ;;  %vm1293_vm6 = vcmask 1045509  }
 0x184   : > { %1746 = vmatprep.subr.mxu0 %v2429_v62  ;;  %1781 = vmatprep.subr.mxu1 %v2429_v62  ;;  %v610_v4 = vld [vmem:[%s2693_s21 + $0xe0] sm:$0xff]  ;;  %v609_v6 = vld [vmem:[%s2693_s21 + $0xd8] sm:$0xff]  ;;  %v608_v8 = vld [vmem:[%s2693_s21 + $0xd0] sm:$0xff]  ;;  %vm1296_vm7 = vcmask 1046534   ;;  %s1563_s11 = sshll.u32 %s1304_s6, 3  ;;  %vm1299_vm8 = vcmask 1047559  }
 0x185   : > { %1776 = vmatprep.mubr.msk.f32.mxu0 %vm2430_vm1, %v2429_v62  ;;  %1811 = vmatprep.mubr.msk.f32.mxu1 %vm2430_vm1, %v2429_v62  ;;  %v591_v9 = vld [vmem:[%s2693_s21 + $0x48] sm:$0xff]  ;;  %v590_v11 = vld [vmem:[%s2693_s21 + $0x40] sm:$0xff]  ;;  %v589_v13 = vld [vmem:[%s2693_s21 + $0x38] sm:$0xff]  ;;  %s1307_s1 = scalar_lea.vmem %s2702_s16, %s1563_s11 [#allocation14]  ;;  %vm1333_vm10 = vcmask 7168   ;;  %p1564_p13 = scmp.ne.s32.totalorder %s2396_s24, 1 }
 0x186   : > { %v607_v10 = vld [vmem:[%s2693_s21 + $0xc8] sm:$0xff]  ;;  %v606_v12 = vld [vmem:[%s2693_s21 + $0xc0] sm:$0xff]  ;;  %v605_v14 = vld [vmem:[%s2693_s21 + $0xb8] sm:$0xff] }
 0x187   : > { %1747 = vmatpush3.xpose.msra.mxu0 %v596_v63  ;;  %1782 = vmatpush3.xpose.msra.mxu1 %v612_v0  ;;  %v588_v15 = vld [vmem:[%s2693_s21 + $0x30] sm:$0xff]  ;;  %v587_v17 = vld [vmem:[%s2693_s21 + $0x28] sm:$0xff]  ;;  %v586_v19 = vld [vmem:[%s2693_s21 + $0x20] sm:$0xff] }
 0x188   : > { %1748 = vmatprep.subr.mxu0 %v2429_v62  ;;  %1783 = vmatprep.subr.mxu1 %v2429_v62  ;;  %v604_v16 = vld [vmem:[%s2693_s21 + $0xb0] sm:$0xff]  ;;  %v603_v18 = vld [vmem:[%s2693_s21 + $0xa8] sm:$0xff]  ;;  %v602_v20 = vld [vmem:[%s2693_s21 + $0xa0] sm:$0xff] }
 0x189   : > { %v585_v21 = vld [vmem:[%s2693_s21 + $0x18] sm:$0xff]  ;;  %v584_v23 = vld [vmem:[%s2693_s21 + $0x10] sm:$0xff]  ;;  %v583_v25 = vld [vmem:[%s2693_s21 + $0x8] sm:$0xff] }
 0x18a   : > { %v601_v22 = vld [vmem:[%s2693_s21 + $0x98] sm:$0xff]  ;;  %v600_v24 = vld [vmem:[%s2693_s21 + $0x90] sm:$0xff]  ;;  %v599_v26 = vld [vmem:[%s2693_s21 + $0x88] sm:$0xff] }
 0x18b   : > { %1749 = vmatpush3.xpose.msra.mxu0 %v595_v1  ;;  %1784 = vmatpush3.xpose.msra.mxu1 %v611_v2  ;;  %v582_v27 = vld [vmem:[%s2693_s21] sm:$0xff]  ;;  %v629_v31 = vld [vmem:[%s2693_s21 + $0x178] sm:$0xff]  ;;  %v628_v33 = vld [vmem:[%s2693_s21 + $0x170] sm:$0xff] }
 0x18c   : > { %1750 = vmatprep.subr.mxu0 %v2429_v62  ;;  %1785 = vmatprep.subr.mxu1 %v2429_v62  ;;  %v598_v28 = vld [vmem:[%s2693_s21 + $0x80] sm:$0xff]  ;;  %v645_v32 = vld [vmem:[%s2693_s21 + $0x1f8] sm:$0xff]  ;;  %v644_v34 = vld [vmem:[%s2693_s21 + $0x1f0] sm:$0xff] }
 0x18d   : > { %v574_v29 = vld [vmem:[#allocation2] sm:$0x1]  ;;  %v575_v30 = vld [vmem:[#allocation2 + $0x1] sm:$0x1]  ;;  %v627_v35 = vld [vmem:[%s2693_s21 + $0x168] sm:$0xff] }
 0x18e   : > { %v643_v36 = vld [vmem:[%s2693_s21 + $0x1e8] sm:$0xff]  ;;  %v626_v37 = vld [vmem:[%s2693_s21 + $0x160] sm:$0xff]  ;;  %v625_v39 = vld [vmem:[%s2693_s21 + $0x158] sm:$0xff] }
 0x18f   : > { %1751 = vmatpush3.xpose.msra.mxu0 %v594_v3  ;;  %1786 = vmatpush3.xpose.msra.mxu1 %v610_v4  ;;  %v642_v38 = vld [vmem:[%s2693_s21 + $0x1e0] sm:$0xff]  ;;  %v641_v40 = vld [vmem:[%s2693_s21 + $0x1d8] sm:$0xff]  ;;  %v624_v41 = vld [vmem:[%s2693_s21 + $0x150] sm:$0xff] }
 0x190   : > { %1752 = vmatprep.subr.mxu0 %v2429_v62  ;;  %1787 = vmatprep.subr.mxu1 %v2429_v62  ;;  %v640_v42 = vld [vmem:[%s2693_s21 + $0x1d0] sm:$0xff]  ;;  %v623_v43 = vld [vmem:[%s2693_s21 + $0x148] sm:$0xff]  ;;  %v622_v45 = vld [vmem:[%s2693_s21 + $0x140] sm:$0xff] }
 0x191   : > { %v639_v44 = vld [vmem:[%s2693_s21 + $0x1c8] sm:$0xff]  ;;  %v638_v46 = vld [vmem:[%s2693_s21 + $0x1c0] sm:$0xff]  ;;  %v621_v47 = vld [vmem:[%s2693_s21 + $0x138] sm:$0xff] }
 0x192   : > { %v637_v48 = vld [vmem:[%s2693_s21 + $0x1b8] sm:$0xff]  ;;  %v620_v49 = vld [vmem:[%s2693_s21 + $0x130] sm:$0xff]  ;;  %v619_v51 = vld [vmem:[%s2693_s21 + $0x128] sm:$0xff] }
 0x193   : > { %1753 = vmatpush3.xpose.msra.mxu0 %v593_v5  ;;  %1788 = vmatpush3.xpose.msra.mxu1 %v609_v6  ;;  %v636_v50 = vld [vmem:[%s2693_s21 + $0x1b0] sm:$0xff]  ;;  %v635_v52 = vld [vmem:[%s2693_s21 + $0x1a8] sm:$0xff]  ;;  %v618_v53 = vld [vmem:[%s2693_s21 + $0x120] sm:$0xff] }
 0x194   : > { %1754 = vmatprep.subr.mxu0 %v2429_v62  ;;  %1789 = vmatprep.subr.mxu1 %v2429_v62  ;;  %v634_v54 = vld [vmem:[%s2693_s21 + $0x1a0] sm:$0xff]  ;;  %v617_v55 = vld [vmem:[%s2693_s21 + $0x118] sm:$0xff]  ;;  %v616_v57 = vld [vmem:[%s2693_s21 + $0x110] sm:$0xff] }
 0x195   : > { %v633_v56 = vld [vmem:[%s2693_s21 + $0x198] sm:$0xff]  ;;  %v632_v58 = vld [vmem:[%s2693_s21 + $0x190] sm:$0xff]  ;;  %v615_v59 = vld [vmem:[%s2693_s21 + $0x108] sm:$0xff] }
 0x196   : > { %v631_v60 = vld [vmem:[%s2693_s21 + $0x188] sm:$0xff]  ;;  %v614_v61 = vld [vmem:[%s2693_s21 + $0x100] sm:$0xff]  ;;  %v661_v2 = vld [vmem:[%s2693_s21 + $0x278] sm:$0xff] }
 0x197   : > { %1755 = vmatpush3.xpose.msra.mxu0 %v592_v7  ;;  %1790 = vmatpush3.xpose.msra.mxu1 %v608_v8  ;;  %v630_v63 = vld [vmem:[%s2693_s21 + $0x180] sm:$0xff]  ;;  %v576_v0 = vld [vmem:[#allocation2 + $0x2] sm:$0x1]  ;;  %v577_v1 = vld [vmem:[#allocation2 + $0x3] sm:$0x1] }
 0x198   : > { %1756 = vmatprep.subr.mxu0 %v2429_v62  ;;  %1791 = vmatprep.subr.mxu1 %v2429_v62  ;;  %v677_v3 = vld [vmem:[%s2693_s21 + $0x2f8] sm:$0xff]  ;;  %v660_v4 = vld [vmem:[%s2693_s21 + $0x270] sm:$0xff]  ;;  %v659_v6 = vld [vmem:[%s2693_s21 + $0x268] sm:$0xff] }
 0x199   : > { %v676_v5 = vld [vmem:[%s2693_s21 + $0x2f0] sm:$0xff]  ;;  %v675_v7 = vld [vmem:[%s2693_s21 + $0x2e8] sm:$0xff]  ;;  %v658_v8 = vld [vmem:[%s2693_s21 + $0x260] sm:$0xff] }
 0x19b   : > { %1757 = vmatpush3.xpose.msra.mxu0 %v591_v9  ;;  %1792 = vmatpush3.xpose.msra.mxu1 %v607_v10  ;;  %v674_v9 = vld [vmem:[%s2693_s21 + $0x2e0] sm:$0xff]  ;;  %v657_v10 = vld [vmem:[%s2693_s21 + $0x258] sm:$0xff] }
 0x19c   : > { %1758 = vmatprep.subr.mxu0 %v2429_v62  ;;  %1793 = vmatprep.subr.mxu1 %v2429_v62 }
 0x19f   : > { %1759 = vmatpush3.xpose.msra.mxu0 %v590_v11  ;;  %1794 = vmatpush3.xpose.msra.mxu1 %v606_v12  ;;  %v673_v11 = vld [vmem:[%s2693_s21 + $0x2d8] sm:$0xff]  ;;  %v656_v12 = vld [vmem:[%s2693_s21 + $0x250] sm:$0xff] }
 0x1a0   : > { %1760 = vmatprep.subr.mxu0 %v2429_v62  ;;  %1795 = vmatprep.subr.mxu1 %v2429_v62 }
 0x1a3   : > { %1761 = vmatpush3.xpose.msra.mxu0 %v589_v13  ;;  %1796 = vmatpush3.xpose.msra.mxu1 %v605_v14  ;;  %v672_v13 = vld [vmem:[%s2693_s21 + $0x2d0] sm:$0xff]  ;;  %v655_v14 = vld [vmem:[%s2693_s21 + $0x248] sm:$0xff] }
 0x1a4   : > { %1762 = vmatprep.subr.mxu0 %v2429_v62  ;;  %1797 = vmatprep.subr.mxu1 %v2429_v62 }
 0x1a7   : > { %1763 = vmatpush3.xpose.msra.mxu0 %v588_v15  ;;  %1798 = vmatpush3.xpose.msra.mxu1 %v604_v16  ;;  %v671_v15 = vld [vmem:[%s2693_s21 + $0x2c8] sm:$0xff]  ;;  %v654_v16 = vld [vmem:[%s2693_s21 + $0x240] sm:$0xff] }
 0x1a8   : > { %1764 = vmatprep.subr.mxu0 %v2429_v62  ;;  %1799 = vmatprep.subr.mxu1 %v2429_v62 }
 0x1ab   : > { %1765 = vmatpush3.xpose.msra.mxu0 %v587_v17  ;;  %1800 = vmatpush3.xpose.msra.mxu1 %v603_v18  ;;  %v670_v17 = vld [vmem:[%s2693_s21 + $0x2c0] sm:$0xff]  ;;  %v653_v18 = vld [vmem:[%s2693_s21 + $0x238] sm:$0xff] }
 0x1ac   : > { %1766 = vmatprep.subr.mxu0 %v2429_v62  ;;  %1801 = vmatprep.subr.mxu1 %v2429_v62 }
 0x1af   : > { %1767 = vmatpush3.xpose.msra.mxu0 %v586_v19  ;;  %1802 = vmatpush3.xpose.msra.mxu1 %v602_v20  ;;  %v669_v19 = vld [vmem:[%s2693_s21 + $0x2b8] sm:$0xff]  ;;  %v652_v20 = vld [vmem:[%s2693_s21 + $0x230] sm:$0xff] }
 0x1b0   : > { %1768 = vmatprep.subr.mxu0 %v2429_v62  ;;  %1803 = vmatprep.subr.mxu1 %v2429_v62 }
 0x1b3   : > { %1769 = vmatpush3.xpose.msra.mxu0 %v585_v21  ;;  %1804 = vmatpush3.xpose.msra.mxu1 %v601_v22  ;;  %v668_v21 = vld [vmem:[%s2693_s21 + $0x2b0] sm:$0xff]  ;;  %v651_v22 = vld [vmem:[%s2693_s21 + $0x228] sm:$0xff] }
 0x1b4   : > { %1770 = vmatprep.subr.mxu0 %v2429_v62  ;;  %1805 = vmatprep.subr.mxu1 %v2429_v62 }
 0x1b7   : > { %1771 = vmatpush3.xpose.msra.mxu0 %v584_v23  ;;  %1806 = vmatpush3.xpose.msra.mxu1 %v600_v24  ;;  %v667_v23 = vld [vmem:[%s2693_s21 + $0x2a8] sm:$0xff]  ;;  %v650_v24 = vld [vmem:[%s2693_s21 + $0x220] sm:$0xff] }
 0x1b8   : > { %1772 = vmatprep.subr.mxu0 %v2429_v62  ;;  %1807 = vmatprep.subr.mxu1 %v2429_v62 }
 0x1bb   : > { %1773 = vmatpush3.xpose.msra.mxu0 %v583_v25  ;;  %1808 = vmatpush3.xpose.msra.mxu1 %v599_v26  ;;  %v666_v25 = vld [vmem:[%s2693_s21 + $0x2a0] sm:$0xff]  ;;  %v649_v26 = vld [vmem:[%s2693_s21 + $0x218] sm:$0xff] }
 0x1bc   : > { %1774 = vmatprep.subr.mxu0 %v2429_v62  ;;  %1809 = vmatprep.subr.mxu1 %v2429_v62 }
 0x1bf   : > { %1775 = vmatpush3.xpose.msra.mxu0 %v582_v27  ;;  %1810 = vmatpush3.xpose.msra.mxu1 %v598_v28  ;;  %v665_v27 = vld [vmem:[%s2693_s21 + $0x298] sm:$0xff]  ;;  %v648_v28 = vld [vmem:[%s2693_s21 + $0x210] sm:$0xff] }
 0x1c0   : > { %1814 = vmatprep.subr.mxu0 %v2429_v62  ;;  %1849 = vmatprep.subr.mxu1 %v2429_v62 }
 0x1c2   : > { %1777 = vmatmul.mubr.f32.vlgmr.msra.gmra.mxu0 %v574_v29  ;;  %1812 = vmatmul.mubr.f32.vlgmr.msra.gmra.mxu1 %v575_v30  ;;  %v664_v29 = vld [vmem:[%s2693_s21 + $0x290] sm:$0xff]  ;;  %v647_v30 = vld [vmem:[%s2693_s21 + $0x208] sm:$0xff] }
 0x1c3   : > { %1815 = vmatpush3.xpose.msra.mxu0 %v629_v31  ;;  %1850 = vmatpush3.xpose.msra.mxu1 %v645_v32  ;;  %v663_v31 = vld [vmem:[%s2693_s21 + $0x288] sm:$0xff]  ;;  %v646_v32 = vld [vmem:[%s2693_s21 + $0x200] sm:$0xff] }
 0x1c4   : > { %1816 = vmatprep.subr.mxu0 %v2429_v62  ;;  %1851 = vmatprep.subr.mxu1 %v2429_v62 }
 0x1c5   : > { %1846 = vmatprep.mubr.msk.f32.mxu0 %vm2430_vm1, %v2429_v62  ;;  %1881 = vmatprep.mubr.msk.f32.mxu1 %vm2430_vm1, %v2429_v62 }
 0x1c7   : > { %1817 = vmatpush3.xpose.msra.mxu0 %v628_v33  ;;  %1852 = vmatpush3.xpose.msra.mxu1 %v644_v34  ;;  %v662_v33 = vld [vmem:[%s2693_s21 + $0x280] sm:$0xff]  ;;  %v578_v34 = vld [vmem:[#allocation2 + $0x4] sm:$0x1] }
 0x1c8   : > { %1818 = vmatprep.subr.mxu0 %v2429_v62  ;;  %1853 = vmatprep.subr.mxu1 %v2429_v62 }
 0x1cb   : > { %1819 = vmatpush3.xpose.msra.mxu0 %v627_v35  ;;  %1854 = vmatpush3.xpose.msra.mxu1 %v643_v36  ;;  %v579_v35 = vld [vmem:[#allocation2 + $0x5] sm:$0x1]  ;;  %v693_v36 = vld [vmem:[%s2693_s21 + $0x378] sm:$0xff] }
 0x1cc   : > { %1820 = vmatprep.subr.mxu0 %v2429_v62  ;;  %1855 = vmatprep.subr.mxu1 %v2429_v62 }
 0x1cf   : > { %1821 = vmatpush3.xpose.msra.mxu0 %v626_v37  ;;  %1856 = vmatpush3.xpose.msra.mxu1 %v642_v38  ;;  %v709_v37 = vld [vmem:[%s2693_s21 + $0x3f8] sm:$0xff]  ;;  %v692_v38 = vld [vmem:[%s2693_s21 + $0x370] sm:$0xff] }
 0x1d0   : > { %1822 = vmatprep.subr.mxu0 %v2429_v62  ;;  %1857 = vmatprep.subr.mxu1 %v2429_v62 }
 0x1d3   : > { %1823 = vmatpush3.xpose.msra.mxu0 %v625_v39  ;;  %1858 = vmatpush3.xpose.msra.mxu1 %v641_v40  ;;  %v708_v39 = vld [vmem:[%s2693_s21 + $0x3f0] sm:$0xff]  ;;  %v691_v40 = vld [vmem:[%s2693_s21 + $0x368] sm:$0xff] }
 0x1d4   : > { %1824 = vmatprep.subr.mxu0 %v2429_v62  ;;  %1859 = vmatprep.subr.mxu1 %v2429_v62 }
 0x1d7   : > { %1825 = vmatpush3.xpose.msra.mxu0 %v624_v41  ;;  %1860 = vmatpush3.xpose.msra.mxu1 %v640_v42  ;;  %v707_v41 = vld [vmem:[%s2693_s21 + $0x3e8] sm:$0xff]  ;;  %v690_v42 = vld [vmem:[%s2693_s21 + $0x360] sm:$0xff] }
 0x1d8   : > { %1826 = vmatprep.subr.mxu0 %v2429_v62  ;;  %1861 = vmatprep.subr.mxu1 %v2429_v62 }
 0x1db   : > { %1827 = vmatpush3.xpose.msra.mxu0 %v623_v43  ;;  %1862 = vmatpush3.xpose.msra.mxu1 %v639_v44  ;;  %v706_v43 = vld [vmem:[%s2693_s21 + $0x3e0] sm:$0xff]  ;;  %v689_v44 = vld [vmem:[%s2693_s21 + $0x358] sm:$0xff] }
 0x1dc   : > { %1828 = vmatprep.subr.mxu0 %v2429_v62  ;;  %1863 = vmatprep.subr.mxu1 %v2429_v62 }
 0x1df   : > { %1829 = vmatpush3.xpose.msra.mxu0 %v622_v45  ;;  %1864 = vmatpush3.xpose.msra.mxu1 %v638_v46  ;;  %v705_v45 = vld [vmem:[%s2693_s21 + $0x3d8] sm:$0xff]  ;;  %v688_v46 = vld [vmem:[%s2693_s21 + $0x350] sm:$0xff] }
 0x1e0   : > { %1830 = vmatprep.subr.mxu0 %v2429_v62  ;;  %1865 = vmatprep.subr.mxu1 %v2429_v62 }
 0x1e3   : > { %1831 = vmatpush3.xpose.msra.mxu0 %v621_v47  ;;  %1866 = vmatpush3.xpose.msra.mxu1 %v637_v48  ;;  %v704_v47 = vld [vmem:[%s2693_s21 + $0x3d0] sm:$0xff]  ;;  %v687_v48 = vld [vmem:[%s2693_s21 + $0x348] sm:$0xff] }
 0x1e4   : > { %1832 = vmatprep.subr.mxu0 %v2429_v62  ;;  %1867 = vmatprep.subr.mxu1 %v2429_v62 }
 0x1e7   : > { %1833 = vmatpush3.xpose.msra.mxu0 %v620_v49  ;;  %1868 = vmatpush3.xpose.msra.mxu1 %v636_v50  ;;  %v703_v49 = vld [vmem:[%s2693_s21 + $0x3c8] sm:$0xff]  ;;  %v686_v50 = vld [vmem:[%s2693_s21 + $0x340] sm:$0xff] }
 0x1e8   : > { %1834 = vmatprep.subr.mxu0 %v2429_v62  ;;  %1869 = vmatprep.subr.mxu1 %v2429_v62 }
 0x1eb   : > { %1835 = vmatpush3.xpose.msra.mxu0 %v619_v51  ;;  %1870 = vmatpush3.xpose.msra.mxu1 %v635_v52  ;;  %v702_v51 = vld [vmem:[%s2693_s21 + $0x3c0] sm:$0xff]  ;;  %v685_v52 = vld [vmem:[%s2693_s21 + $0x338] sm:$0xff] }
 0x1ec   : > { %1836 = vmatprep.subr.mxu0 %v2429_v62  ;;  %1871 = vmatprep.subr.mxu1 %v2429_v62 }
 0x1ef   : > { %1837 = vmatpush3.xpose.msra.mxu0 %v618_v53  ;;  %1872 = vmatpush3.xpose.msra.mxu1 %v634_v54  ;;  %v701_v53 = vld [vmem:[%s2693_s21 + $0x3b8] sm:$0xff]  ;;  %v684_v54 = vld [vmem:[%s2693_s21 + $0x330] sm:$0xff] }
 0x1f0   : > { %1838 = vmatprep.subr.mxu0 %v2429_v62  ;;  %1873 = vmatprep.subr.mxu1 %v2429_v62 }
 0x1f3   : > { %1839 = vmatpush3.xpose.msra.mxu0 %v617_v55  ;;  %1874 = vmatpush3.xpose.msra.mxu1 %v633_v56  ;;  %v700_v55 = vld [vmem:[%s2693_s21 + $0x3b0] sm:$0xff]  ;;  %v683_v56 = vld [vmem:[%s2693_s21 + $0x328] sm:$0xff] }
 0x1f4   : > { %1840 = vmatprep.subr.mxu0 %v2429_v62  ;;  %1875 = vmatprep.subr.mxu1 %v2429_v62 }
 0x1f7   : > { %1841 = vmatpush3.xpose.msra.mxu0 %v616_v57  ;;  %1876 = vmatpush3.xpose.msra.mxu1 %v632_v58  ;;  %v699_v57 = vld [vmem:[%s2693_s21 + $0x3a8] sm:$0xff]  ;;  %v682_v58 = vld [vmem:[%s2693_s21 + $0x320] sm:$0xff] }
 0x1f8   : > { %1842 = vmatprep.subr.mxu0 %v2429_v62  ;;  %1877 = vmatprep.subr.mxu1 %v2429_v62 }
 0x1fb   : > { %1843 = vmatpush3.xpose.msra.mxu0 %v615_v59  ;;  %1878 = vmatpush3.xpose.msra.mxu1 %v631_v60  ;;  %v698_v59 = vld [vmem:[%s2693_s21 + $0x3a0] sm:$0xff]  ;;  %v681_v60 = vld [vmem:[%s2693_s21 + $0x318] sm:$0xff] }
 0x1fc   : > { %1844 = vmatprep.subr.mxu0 %v2429_v62  ;;  %1879 = vmatprep.subr.mxu1 %v2429_v62 }
 0x1ff   : > { %1845 = vmatpush3.xpose.msra.mxu0 %v614_v61  ;;  %1880 = vmatpush3.xpose.msra.mxu1 %v630_v63  ;;  %v697_v61 = vld [vmem:[%s2693_s21 + $0x398] sm:$0xff]  ;;  %v680_v63 = vld [vmem:[%s2693_s21 + $0x310] sm:$0xff] }
 0x200   : > { %1884 = vmatprep.subr.mxu0 %v2429_v62  ;;  %1919 = vmatprep.subr.mxu1 %v2429_v62 }
 0x202   : > { %1847 = vmatmul.mubr.f32.vlgmr.msra.gmra.mxu0 %v576_v0  ;;  %1882 = vmatmul.mubr.f32.vlgmr.msra.gmra.mxu1 %v577_v1  ;;  %v696_v0 = vld [vmem:[%s2693_s21 + $0x390] sm:$0xff]  ;;  %v679_v1 = vld [vmem:[%s2693_s21 + $0x308] sm:$0xff] }
 0x203   : > { %1885 = vmatpush3.xpose.msra.mxu0 %v661_v2  ;;  %1920 = vmatpush3.xpose.msra.mxu1 %v677_v3  ;;  %v695_v2 = vld [vmem:[%s2693_s21 + $0x388] sm:$0xff]  ;;  %v678_v3 = vld [vmem:[%s2693_s21 + $0x300] sm:$0xff] }
 0x204   : > { %1886 = vmatprep.subr.mxu0 %v2429_v62  ;;  %1921 = vmatprep.subr.mxu1 %v2429_v62 }
 0x205   : > { %1916 = vmatprep.mubr.msk.f32.mxu0 %vm2430_vm1, %v2429_v62  ;;  %1951 = vmatprep.mubr.msk.f32.mxu1 %vm2430_vm1, %v2429_v62 }
 0x207   : > { %1887 = vmatpush3.xpose.msra.mxu0 %v660_v4  ;;  %1922 = vmatpush3.xpose.msra.mxu1 %v676_v5  ;;  %v694_v4 = vld [vmem:[%s2693_s21 + $0x380] sm:$0xff]  ;;  %v580_v5 = vld [vmem:[#allocation2 + $0x6] sm:$0x1] }
 0x208   : > { %1888 = vmatprep.subr.mxu0 %v2429_v62  ;;  %1923 = vmatprep.subr.mxu1 %v2429_v62 }
 0x20b   : > { %1889 = vmatpush3.xpose.msra.mxu0 %v659_v6  ;;  %1924 = vmatpush3.xpose.msra.mxu1 %v675_v7  ;;  %v581_v6 = vld [vmem:[#allocation2 + $0x7] sm:$0x1] }
 0x20c   : > { %1890 = vmatprep.subr.mxu0 %v2429_v62  ;;  %1925 = vmatprep.subr.mxu1 %v2429_v62 }
 0x20f   : > { %1891 = vmatpush3.xpose.msra.mxu0 %v658_v8  ;;  %1926 = vmatpush3.xpose.msra.mxu1 %v674_v9 }
 0x210   : > { %1892 = vmatprep.subr.mxu0 %v2429_v62  ;;  %1927 = vmatprep.subr.mxu1 %v2429_v62 }
 0x213   : > { %1893 = vmatpush3.xpose.msra.mxu0 %v657_v10  ;;  %1928 = vmatpush3.xpose.msra.mxu1 %v673_v11 }
 0x214   : > { %1894 = vmatprep.subr.mxu0 %v2429_v62  ;;  %1929 = vmatprep.subr.mxu1 %v2429_v62 }
 0x217   : > { %1895 = vmatpush3.xpose.msra.mxu0 %v656_v12  ;;  %1930 = vmatpush3.xpose.msra.mxu1 %v672_v13 }
 0x218   : > { %1896 = vmatprep.subr.mxu0 %v2429_v62  ;;  %1931 = vmatprep.subr.mxu1 %v2429_v62 }
 0x21b   : > { %1897 = vmatpush3.xpose.msra.mxu0 %v655_v14  ;;  %1932 = vmatpush3.xpose.msra.mxu1 %v671_v15 }
 0x21c   : > { %1898 = vmatprep.subr.mxu0 %v2429_v62  ;;  %1933 = vmatprep.subr.mxu1 %v2429_v62 }
 0x21f   : > { %1899 = vmatpush3.xpose.msra.mxu0 %v654_v16  ;;  %1934 = vmatpush3.xpose.msra.mxu1 %v670_v17 }
 0x220   : > { %1900 = vmatprep.subr.mxu0 %v2429_v62  ;;  %1935 = vmatprep.subr.mxu1 %v2429_v62 }
 0x223   : > { %1901 = vmatpush3.xpose.msra.mxu0 %v653_v18  ;;  %1936 = vmatpush3.xpose.msra.mxu1 %v669_v19 }
 0x224   : > { %1902 = vmatprep.subr.mxu0 %v2429_v62  ;;  %1937 = vmatprep.subr.mxu1 %v2429_v62 }
 0x227   : > { %1903 = vmatpush3.xpose.msra.mxu0 %v652_v20  ;;  %1938 = vmatpush3.xpose.msra.mxu1 %v668_v21 }
 0x228   : > { %1904 = vmatprep.subr.mxu0 %v2429_v62  ;;  %1939 = vmatprep.subr.mxu1 %v2429_v62 }
 0x22b   : > { %1905 = vmatpush3.xpose.msra.mxu0 %v651_v22  ;;  %1940 = vmatpush3.xpose.msra.mxu1 %v667_v23 }
 0x22c   : > { %1906 = vmatprep.subr.mxu0 %v2429_v62  ;;  %1941 = vmatprep.subr.mxu1 %v2429_v62 }
 0x22f   : > { %1907 = vmatpush3.xpose.msra.mxu0 %v650_v24  ;;  %1942 = vmatpush3.xpose.msra.mxu1 %v666_v25 }
 0x230   : > { %1908 = vmatprep.subr.mxu0 %v2429_v62  ;;  %1943 = vmatprep.subr.mxu1 %v2429_v62 }
 0x233   : > { %1909 = vmatpush3.xpose.msra.mxu0 %v649_v26  ;;  %1944 = vmatpush3.xpose.msra.mxu1 %v665_v27  ;;  %v1270_v27 = vld [vmem:[%s351_s18] sm:$0xff] }
 0x234   : > { %1910 = vmatprep.subr.mxu0 %v2429_v62  ;;  %1945 = vmatprep.subr.mxu1 %v2429_v62  ;;  %vm1271_vm9 = vcmp.ne.s32.totalorder %v1270_v27, 0 }
 0x237   : > { %1911 = vmatpush3.xpose.msra.mxu0 %v648_v28  ;;  %1946 = vmatpush3.xpose.msra.mxu1 %v664_v29 }
 0x238   : > { %1912 = vmatprep.subr.mxu0 %v2429_v62  ;;  %1947 = vmatprep.subr.mxu1 %v2429_v62 }
 0x23b   : > { %1913 = vmatpush3.xpose.msra.mxu0 %v647_v30  ;;  %1948 = vmatpush3.xpose.msra.mxu1 %v663_v31 }
 0x23c   : > { %1914 = vmatprep.subr.mxu0 %v2429_v62  ;;  %1949 = vmatprep.subr.mxu1 %v2429_v62 }
 0x23f   : > { %1915 = vmatpush3.xpose.msra.mxu0 %v646_v32  ;;  %1950 = vmatpush3.xpose.msra.mxu1 %v662_v33 }
 0x240   : > { %1954 = vmatprep.subr.mxu0 %v2429_v62  ;;  %1989 = vmatprep.subr.mxu1 %v2429_v62 }
 0x242   : > { %1917 = vmatmul.mubr.f32.vlgmr.msra.gmra.mxu0 %v578_v34  ;;  %1952 = vmatmul.mubr.f32.vlgmr.msra.gmra.mxu1 %v579_v35 }
 0x243   : > { %1955 = vmatpush3.xpose.msra.mxu0 %v693_v36  ;;  %1990 = vmatpush3.xpose.msra.mxu1 %v709_v37 }
 0x244   : > { %1956 = vmatprep.subr.mxu0 %v2429_v62  ;;  %1991 = vmatprep.subr.mxu1 %v2429_v62 }
 0x245   : > { %1986 = vmatprep.mubr.msk.f32.mxu0 %vm2430_vm1, %v2429_v62  ;;  %2021 = vmatprep.mubr.msk.f32.mxu1 %vm2430_vm1, %v2429_v62 }
 0x247   : > { %1957 = vmatpush3.xpose.msra.mxu0 %v692_v38  ;;  %1992 = vmatpush3.xpose.msra.mxu1 %v708_v39  ;;  %v2431_v38 = vmov 0   ;;  %v1309_v39 = vld [vmem:[#allocation3] sm:$0xff] }
 0x248   : > { %1958 = vmatprep.subr.mxu0 %v2429_v62  ;;  %1993 = vmatprep.subr.mxu1 %v2429_v62  ;;  %vm1315_vm12 = vcmp.eq.f32.partialorder %v1309_v39, -inf }
 0x249   : > { %2168 = vset.pattern.permute.xlu0 %v2431_v38 }
 0x24b   : > { %1959 = vmatpush3.xpose.msra.mxu0 %v691_v40  ;;  %1994 = vmatpush3.xpose.msra.mxu1 %v707_v41 }
 0x24c   : > { %1960 = vmatprep.subr.mxu0 %v2429_v62  ;;  %1995 = vmatprep.subr.mxu1 %v2429_v62 }
 0x24f   : > { %1961 = vmatpush3.xpose.msra.mxu0 %v690_v42  ;;  %1996 = vmatpush3.xpose.msra.mxu1 %v706_v43 }
 0x250   : > { %1962 = vmatprep.subr.mxu0 %v2429_v62  ;;  %1997 = vmatprep.subr.mxu1 %v2429_v62 }
 0x253   : > { %1963 = vmatpush3.xpose.msra.mxu0 %v689_v44  ;;  %1998 = vmatpush3.xpose.msra.mxu1 %v705_v45 }
 0x254   : > { %1964 = vmatprep.subr.mxu0 %v2429_v62  ;;  %1999 = vmatprep.subr.mxu1 %v2429_v62 }
 0x257   : > { %1965 = vmatpush3.xpose.msra.mxu0 %v688_v46  ;;  %2000 = vmatpush3.xpose.msra.mxu1 %v704_v47 }
 0x258   : > { %1966 = vmatprep.subr.mxu0 %v2429_v62  ;;  %2001 = vmatprep.subr.mxu1 %v2429_v62 }
 0x25b   : > { %1967 = vmatpush3.xpose.msra.mxu0 %v687_v48  ;;  %2002 = vmatpush3.xpose.msra.mxu1 %v703_v49 }
 0x25c   : > { %1968 = vmatprep.subr.mxu0 %v2429_v62  ;;  %2003 = vmatprep.subr.mxu1 %v2429_v62 }
 0x25f   : > { %1969 = vmatpush3.xpose.msra.mxu0 %v686_v50  ;;  %2004 = vmatpush3.xpose.msra.mxu1 %v702_v51  ;;  %v1320_v50 = vld [vmem:[#allocation4] sm:$0xff] }
 0x260   : > { %1970 = vmatprep.subr.mxu0 %v2429_v62  ;;  %2005 = vmatprep.subr.mxu1 %v2429_v62 }
 0x263   : > { %1971 = vmatpush3.xpose.msra.mxu0 %v685_v52  ;;  %2006 = vmatpush3.xpose.msra.mxu1 %v701_v53 }
 0x264   : > { %1972 = vmatprep.subr.mxu0 %v2429_v62  ;;  %2007 = vmatprep.subr.mxu1 %v2429_v62 }
 0x267   : > { %1973 = vmatpush3.xpose.msra.mxu0 %v684_v54  ;;  %2008 = vmatpush3.xpose.msra.mxu1 %v700_v55 }
 0x268   : > { %1974 = vmatprep.subr.mxu0 %v2429_v62  ;;  %2009 = vmatprep.subr.mxu1 %v2429_v62 }
 0x26b   : > { %1975 = vmatpush3.xpose.msra.mxu0 %v683_v56  ;;  %2010 = vmatpush3.xpose.msra.mxu1 %v699_v57 }
 0x26c   : > { %1976 = vmatprep.subr.mxu0 %v2429_v62  ;;  %2011 = vmatprep.subr.mxu1 %v2429_v62 }
 0x26f   : > { %1977 = vmatpush3.xpose.msra.mxu0 %v682_v58  ;;  %2012 = vmatpush3.xpose.msra.mxu1 %v698_v59 }
 0x270   : > { %1978 = vmatprep.subr.mxu0 %v2429_v62  ;;  %2013 = vmatprep.subr.mxu1 %v2429_v62 }
 0x273   : > { %1979 = vmatpush3.xpose.msra.mxu0 %v681_v60  ;;  %2014 = vmatpush3.xpose.msra.mxu1 %v697_v61 }
 0x274   : > { %1980 = vmatprep.subr.mxu0 %v2429_v62  ;;  %2015 = vmatprep.subr.mxu1 %v2429_v62 }
 0x277   : > { %1981 = vmatpush3.xpose.msra.mxu0 %v680_v63  ;;  %2016 = vmatpush3.xpose.msra.mxu1 %v696_v0 }
 0x278   : > { %1982 = vmatprep.subr.mxu0 %v2429_v62  ;;  %2017 = vmatprep.subr.mxu1 %v2429_v62 }
 0x27b   : > { %1983 = vmatpush3.xpose.msra.mxu0 %v679_v1  ;;  %2018 = vmatpush3.xpose.msra.mxu1 %v695_v2 }
 0x27c   : > { %1984 = vmatprep.subr.mxu0 %v2429_v62  ;;  %2019 = vmatprep.subr.mxu1 %v2429_v62 }
 0x27f   : > { %1985 = vmatpush3.xpose.msra.mxu0 %v678_v3  ;;  %2020 = vmatpush3.xpose.msra.mxu1 %v694_v4 }
 0x282   : > { %v776_v7 = vpop.f32.mrf.mxu0  ;;  %v846_v8 = vpop.f32.mrf.mxu1  ;;  %1987 = vmatmul.mubr.f32.vlgmr.msra.gmra.mxu0 %v580_v5  ;;  %2022 = vmatmul.mubr.f32.vlgmr.msra.gmra.mxu1 %v581_v6 }
 0x283   : > { %v1280_v9 = vrot.slane %v846_v8, 7 }
 0x284   : > { %v1778_v10 = vpop.f32.mrf.mxu0  ;;  %v1813_v11 = vpop.f32.mrf.mxu1 }
 0x285   : > { %v1282_v12 = vsel %vm1281_vm2, %v1280_v9, %v776_v7 }
 0x2c2   : > { %v916_v13 = vpop.f32.mrf.mxu0  ;;  %v986_v14 = vpop.f32.mrf.mxu1 }
 0x2c3   : > { %v1283_v62 = vrot.slane %v916_v13, 6  ;;  %v1286_v15 = vrot.slane %v986_v14, 5 }
 0x2c4   : > { %v1848_v16 = vpop.f32.mrf.mxu0  ;;  %v1883_v17 = vpop.f32.mrf.mxu1 }
 0x2c5   : > { %v1285_v18 = vsel %vm1284_vm3, %v1283_v62, %v1282_v12 }
 0x2c6   : > { %v1288_v19 = vsel %vm1287_vm4, %v1286_v15, %v1285_v18 }
 0x302   : > { %v1056_v20 = vpop.f32.mrf.mxu0  ;;  %v1126_v21 = vpop.f32.mrf.mxu1 }
 0x303   : > { %v1289_v24 = vrot.slane %v1056_v20, 4  ;;  %v1292_v25 = vrot.slane %v1126_v21, 3 }
 0x304   : > { %v1918_v22 = vpop.f32.mrf.mxu0  ;;  %v1953_v23 = vpop.f32.mrf.mxu1 }
 0x305   : > { %v1291_v26 = vsel %vm1290_vm5, %v1289_v24, %v1288_v19 }
 0x306   : > { %v1294_v32 = vsel %vm1293_vm6, %v1292_v25, %v1291_v26 }
 0x342   : > { %v1196_v28 = vpop.f32.mrf.mxu0  ;;  %v1266_v29 = vpop.f32.mrf.mxu1 }
 0x343   : > { %v1295_v30 = vrot.slane %v1196_v28, 2  ;;  %v1298_v31 = vrot.slane %v1266_v29, 1 }
 0x344   : > { %v1988_v33 = vpop.f32.mrf.mxu0  ;;  %v2023_v34 = vpop.f32.mrf.mxu1 }
 0x345   : > { %v1297_v35 = vsel %vm1296_vm7, %v1295_v30, %v1294_v32 }
 0x346   : > { %v1300_v36 = vsel %vm1299_vm8, %v1298_v31, %v1297_v35 }
 0x347   : > { %v1302_v37 = vsel %vm1271_vm9, -inf, %v1300_v36 }
 0x348   : > { %1310 = vmax.xlane.f32.xlu0 %v1302_v37  ;;  %1308 = vst [vmem:[%s1307_s1] sm:$0xff] %v1302_v37 }
 0x3d1   : > { %v1311_v40 = vpop.xlane.xlu0 %1310 }
 0x3d2   : > { %v1312_v41 = vmax.f32 %v1309_v39, %v1311_v40 }
 0x3d4   : > { %1335 = vst.msk [vmem:[#allocation3] sm:$0xff] %vm1333_vm10, %v1312_v41  ;;  %vm1313_vm11 = vcmp.eq.f32.partialorder %v1312_v41, -inf }
 0x3d5   : > { %v1314_v42 = vsel %vm1313_vm11, 0.0, %v1312_v41 }
 0x3d6   : > { %1324 = vperm.xlu0 %2168, %v1314_v42   ;;  %v1316_v47 = vsub.f32 %v1309_v39, %v1314_v42 }
 0x3d8   : > { %v1317_v48 = vmul.f32 1.442695, %v1316_v47 }
 0x451   : > { %v1325_v43 = vpop.permute.xlu0 %1324 }
 0x452   : > { %v1327_v44 = vsub.f32 %v1302_v37, %v1325_v43 }
 0x454   : > { %v1328_v45 = vmul.f32 1.442695, %v1327_v44 }
 0x456   : > { %2169 = vpow2.f32 %v1328_v45 }
 0x457   : > { %2171 = vpow2.f32 %v1317_v48 }
 0x463   : > { %v2170_v46 = vpop.eup %2169 }
 0x464   : > { %1330 = vadd.xlane.f32.xlu1 %v2170_v46  ;;  %v2172_v49 = vpop.eup %2171 }
 0x465   : > { %v1319_v51 = vsel %vm1315_vm12, 0.0, %v2172_v49 }
 0x466   : > { %v1321_v52 = vmul.f32 %v1320_v50, %v1319_v51 }
 0x4ec   : > { %1339 = sbr.rel (%p1564_p13) target bundleno = 1414 (0x586), region = 68 }
 0x4ed   : > { %v1331_v53 = vpop.xlane.xlu1 %1330 }
 0x4ee   : > { %v1332_v54 = vadd.f32 %v1331_v53, %v1321_v52 }
 0x4f0   : > { %1334 = vst.msk [vmem:[#allocation4] sm:$0xff] %vm1333_vm10, %v1332_v54 }
 0x4f1   : > { %v1342_v55 = vld [vmem:[#allocation3] sm:$0xff]  ;;  %v2432_v56 = vmov 0  }
 0x4f2   : > { %2173 = vset.pattern.permute.xlu0 %v2432_v56  ;;  %v1340_v58 = vld [vmem:[%s2702_s16] sm:$0xff]  ;;  %v1341_v59 = vld [vmem:[%s2702_s16 + $0x8] sm:$0xff] }
 0x4f3   : > { %1345 = vperm.xlu0 %2173, %v1342_v55  }
 0x4f7   : > { %v1354_v57 = vld [vmem:[#allocation4] sm:$0xff] }
 0x4f8   : > { %1357 = vperm.xlu0 %2173, %v1354_v57  }
 0x56e   : > { %v1346_v60 = vpop.permute.xlu0 %1345 }
 0x56f   : > { %v1348_v61 = vsub.f32 %v1340_v58, %v1346_v60  ;;  %v1349_v63 = vsub.f32 %v1341_v59, %v1346_v60 }
 0x571   : > { %v1350_v0 = vmul.f32 1.442695, %v1348_v61  ;;  %v1352_v1 = vmul.f32 1.442695, %v1349_v63 }
 0x573   : > { %v1358_v2 = vpop.permute.xlu0 %1357  ;;  %2174 = vpow2.f32 %v1350_v0 }
 0x574   : > { %2176 = vpow2.f32 %v1352_v1 }
 0x575   : > { %2178 = vrcp.f32 %v1358_v2 }
 0x580   : > { %v2175_v3 = vpop.eup %2174 }
 0x581   : > { %v2177_v4 = vpop.eup %2176 }
 0x582   : > { %v2179_v5 = vpop.eup %2178 }
 0x583   : > { %v1361_v6 = vmul.f32 %v2179_v5, %v2175_v3  ;;  %v1362_v7 = vmul.f32 %v2179_v5, %v2177_v4 }
 0x585   : > { %1363 = vst [vmem:[%s2702_s16] sm:$0xff] %v1361_v6  ;;  %1364 = vst [vmem:[%s2702_s16 + $0x8] sm:$0xff] %v1362_v7 }
 0x586 PF: > { %s3097_s24 = sld [smem:[#allocation24_spill]]  ;;  %s1380_s14 = sshll.u32 %s2702_s16, 4  ;;  %s1381_s14 = int_to_ptr.vmem [resolvable:$true] %s1380_s14 }
 0x587   : > { %s3098_s25 = sld [smem:[#allocation29_spill]]  ;;  %s1366_s2 = scalar_lea.sflag [#allocation7], %s2677_s0 }
 0x588   : > { %s3099_s7 = sld [smem:[#allocation35_spill]]  ;;  %s2284_s3 = scalar_lea.vmem %s1381_s14, 256 }
 0x589   : > { %p2285_p0 = scmp.ne.s32.totalorder %s1381_s14, %s2284_s3  ;;  %s2433_s23 = smov [#allocation14]  }
 0x58a   : > { %s2288_s15 = sshll.u32 %s2433_s23, 4  ;;  %s2289_s15 = int_to_ptr.vmem [resolvable:$false] %s2288_s15 }
 0x58b   : > { %s2290_s10 = scalar_lea.vmem %s2289_s15, 512  ;;  %p2291_p5 = scmp.lt.s32.totalorder %s1381_s14, %s2289_s15 }
 0x58c   : > { %s1572_s8 = sshll.u32 %s3097_s24, 8  ;;  %p2292_p8 = scmp.lt.s32.totalorder %s2290_s10, %s2284_s3 }
 0x58d   : > { %p3100_p3 = scmp.ne.s32.totalorder %s3098_s25, 0 }
 0x58e   : > { %s1378_s5 = scalar_lea.hbm %s3099_s7, %s1572_s8  ;;  %p2293_p6 = por %p2292_p8, %p2291_p5 }
 0x58f   : > { %p2286_p2 = pnand %p2285_p0, %p3100_p3 }
 0x591   : > { %p2287_p12 = pneg %p2286_p2 }
 0x593   : > { %p2294_p7 = pnand %p2293_p6, %p2287_p12 }
 0x595   : > { %2297 = shalt.err (!%p2294_p7)
}
 0x596   : > { %s2298_s17 = scalar_lea.hbm %s1378_s5, 256  ;;  %s2302_s21 = scalar_lea.hbm %s3099_s7, 512 }
 0x597   : > { %p2299_p1 = scmp.ne.s32.totalorder %s1378_s5, %s2298_s17  ;;  %p2303_p10 = scmp.lt.s32.totalorder %s1378_s5, %s3099_s7 }
 0x598   : > { %p2304_p11 = scmp.lt.s32.totalorder %s2302_s21, %s2298_s17 }
 0x599   : > { %p2300_p4 = pnand %p2299_p1, %p3100_p3 }
 0x59a   : > { %p2305_p13 = por %p2304_p11, %p2303_p10 }
 0x59b   : > { %p2301_p9 = pneg %p2300_p4 }
 0x59d   : > { %p2306_p0 = pnand %p2305_p13, %p2301_p9 }
 0x59f   : > { %2309 = shalt.err (!%p2306_p0)
}
 0x5a0   : > { %2045 = dma.vmem_to_hbm [thread:$0]  (%p3100_p3), %s1381_s14, 256, %s1378_s5, %s1366_s2  }
 0x5a1 PF: > { %s3101_s16 = sld [smem:[#allocation22_spill]]  ;;  %p2062_p2 = scmp.ge.s32.totalorder %s2412_s28, 2 }
 0x5a2   : > { %s3102_s29 = sld [smem:[#allocation30_spill]] }
 0x5a7   : > { %s1392_s6 = sand.u32 1, %s3101_s16  }
 0x5a8   : > { %p3103_p12 = scmp.ne.s32.totalorder %s3102_s29, 0  ;;  %s1393_s11 = scalar_lea.sflag [#allocation7], %s1392_s6 }
 0x5aa   : > { %p2055_p5 = pnand %p2062_p2, %p3103_p12 }
 0x5ac   : > { %p2056_p8 = pneg %p2055_p5 }
 0x5ae   : > { %2367 = dma.done.wait (%p2056_p8), %s1393_s11, 256  }
 0x5af   : > { %2369 = vsyncadd (%p2056_p8), %s1393_s11, 4294967040  ;;  %s25_s28 = sadd.s32 1, %s2412_s28   ;;  %s3104_s1 = sld [smem:[#allocation28_spill]] }
 0x5b0   : > { %p22_p6 = scmp.ge.s32.totalorder %s25_s28, 6   ;;  %s3105_s24 = sld [smem:[#allocation23_spill]] }
 0x5b1   : > { %s3106_s23 = sld [smem:[#allocation27_spill]]  ;;  %s3109_s18 = smov %s2376_s19 }
 0x5b2   : > { %s3107_s8 = sld [smem:[#allocation25_spill]]  ;;  %s3110_s19 = smov %s2380_s20 }
 0x5b3   : > { %s3108_s30 = sld [smem:[#allocation26_spill]]  ;;  %s3112_s21 = smov %s2388_s22 }
 0x5b4   : > { %s3115_s25 = smov %s2408_s27 }
 0x5b5   : > { %s3111_s20 = smov %s3104_s1  ;;  %24 = sbr.rel (!%p22_p6) target bundleno = 18 (0x12), region = 131 }
 0x5b6   : > { %s3113_s22 = smov %s3105_s24  ;;  %s3114_s24 = smov %s2404_s26 }
 0x5b8   : > { %s3116_s26 = smov %s3107_s8 }
 0x5b9   : > { %s3117_s27 = smov %s3108_s30 }
 0x5ba   :  { %1398 = vsyncpa [#allocation6], 1 }
 0x5bb   :  { %1400 = vsyncpa [#allocation6 + $0x1], 1 }
 0x5bc   :  { %1401 = vsyncpa [#allocation9], 1 }
 0x5bd   :  { %1402 = vsyncpa [#allocation12], 1 }
 0x5be   :  { %1404 = vsyncpa [#allocation12 + $0x1], 1 }
 0x5bf   :  { %1405 = vsyncpa [#allocation7], 1 }
 0x5c0   :  { %1407 = vsyncpa [#allocation7 + $0x1], 1 }

</bundles_post_ra>
